<compile_context>
chip_gen: v6e
topology: v6e:2x2x1
jax: 0.10.0
libtpu: 0.0.40
codegen_flags: <defaults>
</compile_context>

<pallas_src>
import functools
import math

import jax
import jax.numpy as jnp
from jax import lax
from jax.experimental import pallas as pl
from jax.experimental.pallas import tpu as pltpu

_SQRT_HALF = 0.7071067811865476
_EPS = 1e-5          # nn.LayerNorm / nn.GroupNorm default eps
_LANE = 128


def _round_up(n, m):
    return ((n + m - 1) // m) * m


# --------------------------------------------------------------------------
# In-kernel helpers (guaranteed-supported primitives only)
# --------------------------------------------------------------------------
def _erf(v):
    # Abramowitz & Stegun 7.1.26 rational approximation, |err| <= 1.5e-7.
    p = 0.3275911
    a1, a2, a3, a4, a5 = (0.254829592, -0.284496736, 1.421413741,
                          -1.453152027, 1.061405429)
    sgn = jnp.where(v >= 0.0, 1.0, -1.0)
    av = jnp.abs(v)
    t = 1.0 / (1.0 + p * av)
    poly = t * (a1 + t * (a2 + t * (a3 + t * (a4 + t * a5))))
    return sgn * (1.0 - poly * jnp.exp(-av * av))


def _gelu_exact(v):
    return 0.5 * v * (1.0 + _erf(v * _SQRT_HALF))


# --------------------------------------------------------------------------
# Fused sLSTMBlock kernel
# --------------------------------------------------------------------------
def _slstm_block_kernel(conv_as_matmul,
                        x_ref, h_ref, c_ref, n_ref, m_ref, conv_taps_ref,
                        *refs):
    if conv_as_matmul:
        (conv_mat_ref, vc_ref, gn_pool_ref, gn_bcast_ref,
         w_gates_ref, w_up_ref, w_down_ref,
         out_ref, h_out_ref, c_out_ref, n_out_ref, m_out_ref,
         acts_ref) = refs
    else:
        conv_mat_ref = None
        (vc_ref, gn_pool_ref, gn_bcast_ref,
         w_gates_ref, w_up_ref, w_down_ref,
         out_ref, h_out_ref, c_out_ref, n_out_ref, m_out_ref,
         acts_ref) = refs

    f32 = jnp.float32
    bf16 = jnp.bfloat16

    x = x_ref[...].astype(f32)
    h_prev = h_ref[...].astype(f32)
    c_prev = c_ref[...].astype(f32)
    n_prev = n_ref[...].astype(f32)
    m_prev = m_ref[...].astype(f32)

    D = x.shape[-1]
    H = h_prev.shape[-1]
    Ppad = w_down_ref.shape[0]

    # ---- packed per-channel constants (layout matches prepare_params) -----
    ln_w = vc_ref[:, 0:D]
    ln_b = vc_ref[:, D:2 * D]
    gn_w = vc_ref[:, 2 * D:2 * D + H]
    gn_b = vc_ref[:, 2 * D + H:2 * D + 2 * H]
    off = 2 * D + 2 * H
    b_gates = vc_ref[:, off:off + 4 * H]
    off += 4 * H
    b_up = vc_ref[:, off:off + 2 * Ppad]
    off += 2 * Ppad
    b_down = vc_ref[:, off:off + D]

    # ---- LayerNorm(input_size) (f32, VPU) ----------------------------------
    mu = jnp.mean(x, axis=-1, keepdims=True)
    xc = x - mu
    var = jnp.mean(xc * xc, axis=-1, keepdims=True)
    x_norm = xc * lax.rsqrt(var + _EPS) * ln_w + ln_b

    # ---- CausalConv1D(1, 1, 4) + SiLU --------------------------------------
    conv_b = conv_taps_ref[4]
    if conv_as_matmul:
        # D <= 128: the banded (D, D) matrix is a single MXU tile; exact f32.
        pre = jnp.dot(x_norm, conv_mat_ref[...],
                      preferred_element_type=f32) + conv_b
    else:
        # D > 128: 3 XLU lane rolls + edge masks + VPU FMAs (O(D) work, no
        # (D, D) weight resident in VMEM).
        w0 = conv_taps_ref[0]
        w1 = conv_taps_ref[1]
        w2 = conv_taps_ref[2]
        w3 = conv_taps_ref[3]
        lane = lax.broadcasted_iota(jnp.int32, x_norm.shape, 1)
        pre = x_norm * w3 + conv_b
        for shift, tap in ((1, w2), (2, w1), (3, w0)):
            rolled = pltpu.roll(x_norm, shift, axis=1)
            pre = pre + tap * jnp.where(lane >= shift, rolled, 0.0)
    x_conv = pre * jax.nn.sigmoid(pre)  # SiLU

    # ---- single fused gate matmul: [x | x_conv | h_prev] @ W (bf16 MXU) ----
    acts_ref[:, 0:D] = x
    acts_ref[:, D:2 * D] = x_conv
    acts_ref[:, 2 * D:2 * D + H] = h_prev
    gates = jnp.dot(acts_ref[...].astype(bf16), w_gates_ref[...],
                    preferred_element_type=f32) + b_gates

    z = jnp.tanh(gates[:, 0:H])
    o = jax.nn.sigmoid(gates[:, H:2 * H])
    i_tilde = gates[:, 2 * H:3 * H]
    f_tilde = gates[:, 3 * H:4 * H]

    # ---- stabilized sLSTM state update (VPU / EUP) --------------------------
    m_t = jnp.maximum(f_tilde + m_prev, i_tilde)
    i_g = jnp.exp(i_tilde - m_t)
    f_g = jnp.exp(f_tilde + m_prev - m_t)
    c_t = f_g * c_prev + i_g * z
    n_t = f_g * n_prev + i_g
    h_t = o * c_t * pl.reciprocal(n_t, approx=True)

    # ---- GroupNorm(num_heads, hidden_size) via pooled stats (f32, tiny) ----
    pool = gn_pool_ref[...]     # (H, Gpad): 1/group_size on own-group column
    bcast = gn_bcast_ref[...]   # (Gpad, H): 1.0 on own-group channels
    mean_g = jnp.dot(h_t, pool, preferred_element_type=f32)
    mean_b = jnp.dot(mean_g, bcast, preferred_element_type=f32)
    h_c = h_t - mean_b
    var_g = jnp.dot(h_c * h_c, pool, preferred_element_type=f32)
    rstd_b = jnp.dot(lax.rsqrt(var_g + _EPS), bcast,
                     preferred_element_type=f32)
    out_norm = h_c * rstd_b * gn_w + gn_b

    # ---- lane-aligned up-proj (left|right) + exact-GELU gate + down-proj ---
    up = jnp.dot(out_norm.astype(bf16), w_up_ref[...],
                 preferred_element_type=f32) + b_up
    left = up[:, 0:Ppad]
    right = up[:, Ppad:2 * Ppad]
    gated = left * _gelu_exact(right)
    down = jnp.dot(gated.astype(bf16), w_down_ref[...],
                   preferred_element_type=f32) + b_down

    out_ref[...] = (down + x).astype(out_ref.dtype)
    h_out_ref[...] = h_t.astype(h_out_ref.dtype)
    c_out_ref[...] = c_t.astype(c_out_ref.dtype)
    n_out_ref[...] = n_t.astype(n_out_ref.dtype)
    m_out_ref[...] = m_t.astype(m_out_ref.dtype)


# --------------------------------------------------------------------------
# One-time weight fusion / padding / casting (hoisted out of the step path)
# --------------------------------------------------------------------------
def prepare_params(params, *, num_heads, matmul_dtype=jnp.bfloat16):
    f32 = jnp.float32
    D = params["ln_w"].shape[0]
    H = params["gn_w"].shape[0]
    P = params["down_w"].shape[0]
    G = num_heads
    Hg = H // G
    Ppad = _round_up(P, _LANE)
    Gpad = _round_up(G, _LANE)

    # fused gate weight: rows [x | x_conv | h_prev], cols [z | o | i | f]
    zDH = jnp.zeros((D, H), f32)
    w_x = jnp.concatenate([params["wz"], params["wo"], zDH, zDH], axis=1)
    w_xc = jnp.concatenate([zDH, zDH, params["wi"], params["wf"]], axis=1)
    w_h = jnp.concatenate([params["rz"], params["ro"],
                           params["ri"], params["rf"]], axis=1)
    w_gates = jnp.concatenate([w_x, w_xc, w_h], axis=0).astype(matmul_dtype)
    b_gates = jnp.concatenate([params["bz"] + params["rbz"],
                               params["bo"] + params["rbo"],
                               params["bi"] + params["rbi"],
                               params["bf"] + params["rbf"]], axis=0)

    # up-proj, zero-padded to 128-aligned Ppad columns (lane-dense split)
    def _pad_cols(w, b):
        wpad = jnp.zeros((H, Ppad), f32).at[:, :w.shape[1]].set(w)
        bpad = jnp.zeros((Ppad,), f32).at[:b.shape[0]].set(b)
        return wpad, bpad

    up_l_w, up_l_b = _pad_cols(params["up_l_w"], params["up_l_b"])
    up_r_w, up_r_b = _pad_cols(params["up_r_w"], params["up_r_b"])
    w_up = jnp.concatenate([up_l_w, up_r_w], axis=1).astype(matmul_dtype)
    b_up = jnp.concatenate([up_l_b, up_r_b], axis=0)

    w_down = (jnp.zeros((Ppad, D), f32).at[:P, :].set(params["down_w"])
              .astype(matmul_dtype))

    # GroupNorm pooling / broadcast matrices (lane-padded group axis)
    group_ids = jnp.repeat(jnp.arange(G), Hg)
    ar_h = jnp.arange(H)
    gn_pool = jnp.zeros((H, Gpad), f32).at[ar_h, group_ids].set(1.0 / Hg)
    gn_bcast = jnp.zeros((Gpad, H), f32).at[group_ids, ar_h].set(1.0)

    # single packed per-channel constant vector
    vconst = jnp.concatenate([params["ln_w"], params["ln_b"],
                              params["gn_w"], params["gn_b"],
                              b_gates, b_up, params["down_b"]],
                             axis=0)[None, :].astype(f32)

    conv_taps = (jnp.zeros((8,), f32)
                 .at[:4].set(params["conv_w"].astype(f32))
                 .at[4].set(params["conv_b"].astype(f32)))

    fused = dict(w_gates=w_gates, w_up=w_up, w_down=w_down,
                 gn_pool=gn_pool, gn_bcast=gn_bcast,
                 vconst=vconst, conv_taps=conv_taps)

    if D <= _LANE:
        # banded conv matrix: single MXU tile, exact f32 (only built for small D)
        idx = jnp.arange(D)
        diff = idx[None, :] - idx[:, None]            # column(t) - row(s)
        conv_mat = jnp.zeros((D, D), f32)
        for k in range(4):
            conv_mat = conv_mat + jnp.where(diff == (3 - k),
                                            params["conv_w"][k], 0.0)
        fused["conv_mat"] = conv_mat
    return fused


# --------------------------------------------------------------------------
# Wrapper: pallas_call
# --------------------------------------------------------------------------
def _default_vmem_limit():
    # v5e/v6e: 128 MiB physical VMEM; v7x: 64 MiB per TensorCore.
    try:
        cap = pltpu.get_tpu_info().vmem_capacity_bytes
        return min(100 * 1024 * 1024, int(cap * 0.8))
    except Exception:
        return 64 * 1024 * 1024


def slstm_block_forward(fused, x, prev_state, *, block_rows=512,
                        vmem_limit_bytes=None, single_buffer_weights=False):
    f32 = jnp.float32
    h_prev, c_prev, n_prev, m_prev = prev_state
    B, D = x.shape
    H = h_prev.shape[-1]
    Ppad = fused["w_down"].shape[0]
    Gpad = fused["gn_pool"].shape[-1]
    L = fused["vconst"].shape[-1]
    conv_as_matmul = "conv_mat" in fused

    # Row tiling: for large B the 1-D "parallel" grid pipelines HBM<->VMEM and
    # shards row tiles across both TensorCores on v7x (pick block_rows <= B/2
    # there); weights stay VMEM-resident across grid steps.
    tb = B if B <= block_rows else block_rows
    grid = (pl.cdiv(B, tb),)

    if vmem_limit_bytes is None:
        vmem_limit_bytes = _default_vmem_limit()

    def row_spec(cols):
        return pl.BlockSpec((tb, cols), lambda i: (i, 0))

    def const_spec(shape):
        kw = {}
        if single_buffer_weights:
            # constant blocks are revisited every grid step; double-buffering
            # them is pure VMEM waste at production sizes (v7x: 64 MiB VMEM).
            kw["pipeline_mode"] = pl.Buffered(1)
        return pl.BlockSpec(shape, lambda i: (0, 0), **kw)

    smem_spec = pl.BlockSpec(memory_space=pltpu.MemorySpace.SMEM)

    in_specs = [row_spec(D), row_spec(H), row_spec(H), row_spec(H),
                row_spec(H), smem_spec]
    operands = [x.astype(f32), h_prev.astype(f32), c_prev.astype(f32),
                n_prev.astype(f32), m_prev.astype(f32), fused["conv_taps"]]
    if conv_as_matmul:
        in_specs.append(const_spec((D, D)))
        operands.append(fused["conv_mat"])
    in_specs += [const_spec((1, L)), const_spec((H, Gpad)),
                 const_spec((Gpad, H)), const_spec((2 * D + H, 4 * H)),
                 const_spec((H, 2 * Ppad)), const_spec((Ppad, D))]
    operands += [fused["vconst"], fused["gn_pool"], fused["gn_bcast"],
                 fused["w_gates"], fused["w_up"], fused["w_down"]]

    out_specs = (row_spec(D), row_spec(H), row_spec(H), row_spec(H),
                 row_spec(H))
    out_shape = (jax.ShapeDtypeStruct((B, D), f32),
                 jax.ShapeDtypeStruct((B, H), f32),
                 jax.ShapeDtypeStruct((B, H), f32),
                 jax.ShapeDtypeStruct((B, H), f32),
                 jax.ShapeDtypeStruct((B, H), f32))

    kernel = functools.partial(_slstm_block_kernel, conv_as_matmul)

    out, h_t, c_t, n_t, m_t = pl.pallas_call(
        kernel,
        out_shape=out_shape,
        grid=grid,
        in_specs=in_specs,
        out_specs=out_specs,
        scratch_shapes=[pltpu.VMEM((tb, 2 * D + H), jnp.float32)],
        compiler_params=pltpu.CompilerParams(
            dimension_semantics=("parallel",),
            vmem_limit_bytes=vmem_limit_bytes),
    )(*operands)

    return out, (h_t, c_t, n_t, m_t)


# --------------------------------------------------------------------------
# Pure-JAX references (mirror the PyTorch module op-for-op)
# --------------------------------------------------------------------------
def slstm_reference(params, x, prev_state, num_heads, matmul_dtype=None):
    """matmul_dtype=None -> exact f32; jnp.bfloat16 -> mirror the kernel's
    bf16 MXU operand rounding (f32 accumulation)."""
    f32 = jnp.float32
    h_prev, c_prev, n_prev, m_prev = prev_state
    B, D = x.shape
    H = h_prev.shape[-1]

    if matmul_dtype is None:
        def mm(a, w):
            return jnp.dot(a, w, precision=lax.Precision.HIGHEST)
    else:
        def mm(a, w):
            return jnp.dot(a.astype(matmul_dtype), w.astype(matmul_dtype),
                           preferred_element_type=f32)

    mu = jnp.mean(x, -1, keepdims=True)
    var = jnp.mean((x - mu) ** 2, -1, keepdims=True)
    x_norm = (x - mu) / jnp.sqrt(var + _EPS) * params["ln_w"] + params["ln_b"]

    w = params["conv_w"]
    pad = jnp.pad(x_norm, ((0, 0), (3, 0)))
    conv = params["conv_b"] + sum(w[k] * pad[:, k:k + D] for k in range(4))
    x_conv = jax.nn.silu(conv)

    z = jnp.tanh(mm(x, params["wz"]) + params["bz"]
                 + mm(h_prev, params["rz"]) + params["rbz"])
    o = jax.nn.sigmoid(mm(x, params["wo"]) + params["bo"]
                       + mm(h_prev, params["ro"]) + params["rbo"])
    i_tilde = (mm(x_conv, params["wi"]) + params["bi"]
               + mm(h_prev, params["ri"]) + params["rbi"])
    f_tilde = (mm(x_conv, params["wf"]) + params["bf"]
               + mm(h_prev, params["rf"]) + params["rbf"])

    m_t = jnp.maximum(f_tilde + m_prev, i_tilde)
    i_g = jnp.exp(i_tilde - m_t)
    f_g = jnp.exp(f_tilde + m_prev - m_t)
    c_t = f_g * c_prev + i_g * z
    n_t = f_g * n_prev + i_g
    h_t = o * c_t / n_t

    G = num_heads
    hg = h_t.reshape(B, G, H // G)
    gmu = jnp.mean(hg, -1, keepdims=True)
    gvar = jnp.mean((hg - gmu) ** 2, -1, keepdims=True)
    out_norm = (((hg - gmu) / jnp.sqrt(gvar + _EPS)).reshape(B, H)
                * params["gn_w"] + params["gn_b"])

    left = mm(out_norm, params["up_l_w"]) + params["up_l_b"]
    right = mm(out_norm, params["up_r_w"]) + params["up_r_b"]
    gated = left * jax.nn.gelu(right, approximate=False)
    down = mm(gated, params["down_w"]) + params["down_b"]
    return down + x, (h_t, c_t, n_t, m_t)


# --------------------------------------------------------------------------
# Parameter init (PyTorch-style bounds; BlockDiagonal stored as dense mats)
# --------------------------------------------------------------------------
def init_params(key, input_size, hidden_size, num_heads, proj_factor=4.0 / 3.0):
    assert hidden_size % num_heads == 0 and input_size % num_heads == 0
    proj = int(hidden_size * proj_factor)
    f32 = jnp.float32
    keys = iter(jax.random.split(key, 64))

    def uni(shape, bound):
        return jax.random.uniform(next(keys), shape, f32, -bound, bound)

    def block_diag_linear(d_in, d_out, nb):
        bi, bo = d_in // nb, d_out // nb
        bound = 1.0 / math.sqrt(bi)
        wmat = jnp.zeros((d_in, d_out), f32)
        for b in range(nb):
            wmat = wmat.at[b * bi:(b + 1) * bi, b * bo:(b + 1) * bo].set(
                uni((bi, bo), bound))
        return wmat, uni((d_out,), bound)

    p = {}
    p["ln_w"] = 1.0 + uni((input_size,), 0.1)
    p["ln_b"] = uni((input_size,), 0.1)
    p["conv_w"] = uni((4,), 0.5)            # Conv1d(1,1,4): bound = 1/sqrt(4)
    p["conv_b"] = uni((), 0.5)
    for name in ("wz", "wi", "wf", "wo"):
        wmat, b = block_diag_linear(input_size, hidden_size, num_heads)
        p[name] = wmat
        p["b" + name[1]] = b
    for name in ("rz", "ri", "rf", "ro"):
        wmat, b = block_diag_linear(hidden_size, hidden_size, num_heads)
        p[name] = wmat
        p["rb" + name[1]] = b
    p["gn_w"] = 1.0 + uni((hidden_size,), 0.1)
    p["gn_b"] = uni((hidden_size,), 0.1)
    bound = 1.0 / math.sqrt(hidden_size)
    p["up_l_w"] = uni((hidden_size, proj), bound)
    p["up_l_b"] = uni((proj,), bound)
    p["up_r_w"] = uni((hidden_size, proj), bound)
    p["up_r_b"] = uni((proj,), bound)
    bound = 1.0 / math.sqrt(proj)
    p["down_w"] = uni((proj, input_size), bound)
    p["down_b"] = uni((input_size,), bound)
    return p


if __name__ == "__main__":
    key = jax.random.PRNGKey(0)
    k_p, k_x, k_h, k_c, k_n, k_m = jax.random.split(key, 6)

    batch, input_size, hidden_size, num_heads = 8, 128, 128, 4
    params = init_params(k_p, input_size, hidden_size, num_heads)
    # one-time weight fusion / padding / bf16 cast (NOT in the per-step path)
    fused = prepare_params(params, num_heads=num_heads)

    x = jax.random.normal(k_x, (batch, input_size), jnp.float32)
    h_prev = 0.5 * jax.random.normal(k_h, (batch, hidden_size), jnp.float32)
    c_prev = 0.5 * jax.random.normal(k_c, (batch, hidden_size), jnp.float32)
    n_prev = jax.random.uniform(k_n, (batch, hidden_size), jnp.float32,
                                0.5, 1.5)
    m_prev = 0.1 * jax.random.normal(k_m, (batch, hidden_size), jnp.float32)
    state = (h_prev, c_prev, n_prev, m_prev)

    fwd = jax.jit(slstm_block_forward)
    out, (h_t, c_t, n_t, m_t) = fwd(fused, x, state)
    jax.block_until_ready((out, h_t, c_t, n_t, m_t))

    assert out.shape == (batch, input_size), out.shape
    assert bool(jnp.all(jnp.isfinite(out)))

    # Structural check: reference that mirrors the kernel's bf16 MXU operand
    # rounding (tight tolerance; covers the approx reciprocal / erf poly).
    s_out, (s_h, s_c, s_n, s_m) = slstm_reference(
        params, x, state, num_heads, matmul_dtype=jnp.bfloat16)
    # Numerical-drift check: exact float32 reference (loose tolerance covers
    # the intentional bf16 matmul quantization).
    e_out, (e_h, e_c, e_n, e_m) = slstm_reference(params, x, state, num_heads)

    for nm, got, want_s, want_e in (
            ("out", out, s_out, e_out), ("h_t", h_t, s_h, e_h),
            ("c_t", c_t, s_c, e_c), ("n_t", n_t, s_n, e_n),
            ("m_t", m_t, s_m, e_m)):
        err_s = float(jnp.max(jnp.abs(got - want_s)))
        err_e = float(jnp.max(jnp.abs(got - want_e)))
        assert err_s < 3e-2, f"{nm}: structural max abs err {err_s}"
        assert err_e < 1.5e-1, f"{nm}: drift vs f32 reference {err_e}"

    print("KERNEL_OK")
</pallas_src>

<mosaic_0001>
module attributes {stable_mosaic.version = 11 : i64} {
  func.func @_slstm_block_kernel(%arg0: i32, %arg1: memref<8x128xf32, #tpu.memory_space<vmem>>, %arg2: memref<8x128xf32, #tpu.memory_space<vmem>>, %arg3: memref<8x128xf32, #tpu.memory_space<vmem>>, %arg4: memref<8x128xf32, #tpu.memory_space<vmem>>, %arg5: memref<8x128xf32, #tpu.memory_space<vmem>>, %arg6: memref<8xf32, #tpu.memory_space<smem>>, %arg7: memref<128x128xf32, #tpu.memory_space<vmem>>, %arg8: memref<1x1664xf32, #tpu.memory_space<vmem>>, %arg9: memref<128x128xf32, #tpu.memory_space<vmem>>, %arg10: memref<128x128xf32, #tpu.memory_space<vmem>>, %arg11: memref<384x512xbf16, #tpu.memory_space<vmem>>, %arg12: memref<128x512xbf16, #tpu.memory_space<vmem>>, %arg13: memref<256x128xbf16, #tpu.memory_space<vmem>>, %arg14: memref<8x128xf32, #tpu.memory_space<vmem>>, %arg15: memref<8x128xf32, #tpu.memory_space<vmem>>, %arg16: memref<8x128xf32, #tpu.memory_space<vmem>>, %arg17: memref<8x128xf32, #tpu.memory_space<vmem>>, %arg18: memref<8x128xf32, #tpu.memory_space<vmem>>, %arg19: memref<8x384xf32, #tpu.memory_space<vmem>>) attributes {dimension_semantics = [#tpu.dimension_semantics<parallel>], iteration_bounds = array<i64: 1>, scalar_prefetch = 0 : i64, scratch_operands = 1 : i64, tpu.core_type = #tpu.core_type<tc>, window_params = [{transform_indices = @transform_0, window_bounds = array<i64: 8, 128>}, {transform_indices = @transform_1, window_bounds = array<i64: 8, 128>}, {transform_indices = @transform_2, window_bounds = array<i64: 8, 128>}, {transform_indices = @transform_3, window_bounds = array<i64: 8, 128>}, {transform_indices = @transform_4, window_bounds = array<i64: 8, 128>}, {transform_indices = @transform_5, window_bounds = array<i64: 8>}, {pipeline_mode = #tpu.pipeline_mode<synchronous>, transform_indices = @transform_6, window_bounds = array<i64: 128, 128>}, {pipeline_mode = #tpu.pipeline_mode<synchronous>, transform_indices = @transform_7, window_bounds = array<i64: 1, 1664>}, {pipeline_mode = #tpu.pipeline_mode<synchronous>, transform_indices = @transform_8, window_bounds = array<i64: 128, 128>}, {pipeline_mode = #tpu.pipeline_mode<synchronous>, transform_indices = @transform_9, window_bounds = array<i64: 128, 128>}, {pipeline_mode = #tpu.pipeline_mode<synchronous>, transform_indices = @transform_10, window_bounds = array<i64: 384, 512>}, {pipeline_mode = #tpu.pipeline_mode<synchronous>, transform_indices = @transform_11, window_bounds = array<i64: 128, 512>}, {pipeline_mode = #tpu.pipeline_mode<synchronous>, transform_indices = @transform_12, window_bounds = array<i64: 256, 128>}, {transform_indices = @transform_13, window_bounds = array<i64: 8, 128>}, {transform_indices = @transform_14, window_bounds = array<i64: 8, 128>}, {transform_indices = @transform_15, window_bounds = array<i64: 8, 128>}, {transform_indices = @transform_16, window_bounds = array<i64: 8, 128>}, {transform_indices = @transform_17, window_bounds = array<i64: 8, 128>}]} {
    %c0 = arith.constant 0 : index
    %c0_0 = arith.constant 0 : index
    %0 = vector.load %arg1[%c0, %c0_0] : memref<8x128xf32, #tpu.memory_space<vmem>>, vector<8x128xf32>
    %c0_1 = arith.constant 0 : index
    %c0_2 = arith.constant 0 : index
    %1 = vector.load %arg2[%c0_1, %c0_2] : memref<8x128xf32, #tpu.memory_space<vmem>>, vector<8x128xf32>
    %c0_3 = arith.constant 0 : index
    %c0_4 = arith.constant 0 : index
    %2 = vector.load %arg3[%c0_3, %c0_4] : memref<8x128xf32, #tpu.memory_space<vmem>>, vector<8x128xf32>
    %c0_5 = arith.constant 0 : index
    %c0_6 = arith.constant 0 : index
    %3 = vector.load %arg4[%c0_5, %c0_6] : memref<8x128xf32, #tpu.memory_space<vmem>>, vector<8x128xf32>
    %c0_7 = arith.constant 0 : index
    %c0_8 = arith.constant 0 : index
    %4 = vector.load %arg5[%c0_7, %c0_8] : memref<8x128xf32, #tpu.memory_space<vmem>>, vector<8x128xf32>
    %c0_9 = arith.constant 0 : index
    %c0_10 = arith.constant 0 : index
    %5 = vector.load %arg8[%c0_9, %c0_10] : memref<1x1664xf32, #tpu.memory_space<vmem>>, vector<1x128xf32>
    %c0_11 = arith.constant 0 : index
    %c128 = arith.constant 128 : index
    %6 = vector.load %arg8[%c0_11, %c128] : memref<1x1664xf32, #tpu.memory_space<vmem>>, vector<1x128xf32>
    %c0_12 = arith.constant 0 : index
    %c256 = arith.constant 256 : index
    %7 = vector.load %arg8[%c0_12, %c256] : memref<1x1664xf32, #tpu.memory_space<vmem>>, vector<1x128xf32>
    %c0_13 = arith.constant 0 : index
    %c384 = arith.constant 384 : index
    %8 = vector.load %arg8[%c0_13, %c384] : memref<1x1664xf32, #tpu.memory_space<vmem>>, vector<1x128xf32>
    %c0_14 = arith.constant 0 : index
    %c512 = arith.constant 512 : index
    %9 = vector.load %arg8[%c0_14, %c512] : memref<1x1664xf32, #tpu.memory_space<vmem>>, vector<1x512xf32>
    %c0_15 = arith.constant 0 : index
    %c1024 = arith.constant 1024 : index
    %10 = vector.load %arg8[%c0_15, %c1024] : memref<1x1664xf32, #tpu.memory_space<vmem>>, vector<1x512xf32>
    %c0_16 = arith.constant 0 : index
    %c1536 = arith.constant 1536 : index
    %11 = vector.load %arg8[%c0_16, %c1536] : memref<1x1664xf32, #tpu.memory_space<vmem>>, vector<1x128xf32>
    %cst = arith.constant dense<0.000000e+00> : vector<8xf32>
    %12 = vector.multi_reduction <add>, %0, %cst [1] : vector<8x128xf32> to vector<8xf32>
    %13 = vector.shape_cast %12 : vector<8xf32> to vector<8x1xf32>
    %cst_17 = arith.constant 1.280000e+02 : f32
    %14 = vector.broadcast %cst_17 : f32 to vector<8x1xf32>
    %15 = arith.divf %13, %14 : vector<8x1xf32>
    %16 = vector.broadcast %15 : vector<8x1xf32> to vector<8x128xf32>
    %17 = arith.subf %0, %16 : vector<8x128xf32>
    %18 = arith.mulf %17, %17 : vector<8x128xf32>
    %cst_18 = arith.constant dense<0.000000e+00> : vector<8xf32>
    %19 = vector.multi_reduction <add>, %18, %cst_18 [1] : vector<8x128xf32> to vector<8xf32>
    %20 = vector.shape_cast %19 : vector<8xf32> to vector<8x1xf32>
    %cst_19 = arith.constant 1.280000e+02 : f32
    %21 = vector.broadcast %cst_19 : f32 to vector<8x1xf32>
    %22 = arith.divf %20, %21 : vector<8x1xf32>
    %cst_20 = arith.constant 9.99999974E-6 : f32
    %23 = vector.broadcast %cst_20 : f32 to vector<8x1xf32>
    %24 = arith.addf %22, %23 : vector<8x1xf32>
    %25 = math.rsqrt %24 : vector<8x1xf32>
    %26 = vector.broadcast %25 : vector<8x1xf32> to vector<8x128xf32>
    %27 = arith.mulf %17, %26 : vector<8x128xf32>
    %28 = vector.broadcast %5 : vector<1x128xf32> to vector<8x128xf32>
    %29 = arith.mulf %27, %28 : vector<8x128xf32>
    %30 = vector.broadcast %6 : vector<1x128xf32> to vector<8x128xf32>
    %31 = arith.addf %29, %30 : vector<8x128xf32>
    %c4 = arith.constant 4 : index
    %32 = memref.load %arg6[%c4] : memref<8xf32, #tpu.memory_space<smem>>
    %c0_21 = arith.constant 0 : index
    %c0_22 = arith.constant 0 : index
    %33 = vector.load %arg7[%c0_21, %c0_22] : memref<128x128xf32, #tpu.memory_space<vmem>>, vector<128x128xf32>
    %cst_23 = arith.constant dense<0.000000e+00> : vector<8x128xf32>
    %34 = tpu.matmul %31, %33, %cst_23 {dimension_numbers = #tpu.dot_dimension_numbers<[1], [0], [0], [1], [0, 0, 1, 1], [], []>} : vector<8x128xf32>, vector<128x128xf32>, vector<8x128xf32> -> vector<8x128xf32>
    %35 = vector.broadcast %32 : f32 to vector<8x128xf32>
    %36 = arith.addf %34, %35 : vector<8x128xf32>
    %37 = arith.negf %36 : vector<8x128xf32>
    %38 = math.exp %37 : vector<8x128xf32>
    %cst_24 = arith.constant 1.000000e+00 : f32
    %39 = vector.broadcast %cst_24 : f32 to vector<8x128xf32>
    %40 = arith.addf %39, %38 : vector<8x128xf32>
    %41 = arith.divf %39, %40 : vector<8x128xf32>
    %42 = arith.mulf %36, %41 : vector<8x128xf32>
    %c0_25 = arith.constant 0 : index
    %c0_26 = arith.constant 0 : index
    %43 = vector.load %arg19[%c0_25, %c0_26] : memref<8x384xf32, #tpu.memory_space<vmem>>, vector<8x128xf32>
    tpu.vector_store %arg19[%c0_25, %c0_26], %0 {strides = array<i32>} : memref<8x384xf32, #tpu.memory_space<vmem>>, vector<8x128xf32>,
    %c0_27 = arith.constant 0 : index
    %c128_28 = arith.constant 128 : index
    %44 = vector.load %arg19[%c0_27, %c128_28] : memref<8x384xf32, #tpu.memory_space<vmem>>, vector<8x128xf32>
    tpu.vector_store %arg19[%c0_27, %c128_28], %42 {strides = array<i32>} : memref<8x384xf32, #tpu.memory_space<vmem>>, vector<8x128xf32>,
    %c0_29 = arith.constant 0 : index
    %c256_30 = arith.constant 256 : index
    %45 = vector.load %arg19[%c0_29, %c256_30] : memref<8x384xf32, #tpu.memory_space<vmem>>, vector<8x128xf32>
    tpu.vector_store %arg19[%c0_29, %c256_30], %1 {strides = array<i32>} : memref<8x384xf32, #tpu.memory_space<vmem>>, vector<8x128xf32>,
    %c0_31 = arith.constant 0 : index
    %c0_32 = arith.constant 0 : index
    %46 = vector.load %arg19[%c0_31, %c0_32] : memref<8x384xf32, #tpu.memory_space<vmem>>, vector<8x384xf32>
    %47 = arith.truncf %46 : vector<8x384xf32> to vector<8x384xbf16>
    %c0_33 = arith.constant 0 : index
    %c0_34 = arith.constant 0 : index
    %48 = vector.load %arg11[%c0_33, %c0_34] : memref<384x512xbf16, #tpu.memory_space<vmem>>, vector<384x512xbf16>
    %cst_35 = arith.constant dense<0.000000e+00> : vector<8x512xf32>
    %49 = tpu.matmul %47, %48, %cst_35 {dimension_numbers = #tpu.dot_dimension_numbers<[1], [0], [0], [1], [0, 0, 1, 1], [], []>} : vector<8x384xbf16>, vector<384x512xbf16>, vector<8x512xf32> -> vector<8x512xf32>
    %50 = vector.broadcast %9 : vector<1x512xf32> to vector<8x512xf32>
    %51 = arith.addf %49, %50 : vector<8x512xf32>
    %52 = vector.extract_strided_slice %51 {offsets = [0, 0], sizes = [8, 128], strides = [1, 1]} : vector<8x512xf32> to vector<8x128xf32>
    %53 = math.tanh %52 : vector<8x128xf32>
    %54 = vector.extract_strided_slice %51 {offsets = [0, 128], sizes = [8, 128], strides = [1, 1]} : vector<8x512xf32> to vector<8x128xf32>
    %55 = arith.negf %54 : vector<8x128xf32>
    %56 = math.exp %55 : vector<8x128xf32>
    %cst_36 = arith.constant 1.000000e+00 : f32
    %57 = vector.broadcast %cst_36 : f32 to vector<8x128xf32>
    %58 = arith.addf %57, %56 : vector<8x128xf32>
    %59 = arith.divf %57, %58 : vector<8x128xf32>
    %60 = vector.extract_strided_slice %51 {offsets = [0, 256], sizes = [8, 128], strides = [1, 1]} : vector<8x512xf32> to vector<8x128xf32>
    %61 = vector.extract_strided_slice %51 {offsets = [0, 384], sizes = [8, 128], strides = [1, 1]} : vector<8x512xf32> to vector<8x128xf32>
    %62 = arith.addf %61, %4 : vector<8x128xf32>
    %63 = arith.maximumf %62, %60 : vector<8x128xf32>
    %64 = arith.subf %60, %63 : vector<8x128xf32>
    %65 = math.exp %64 : vector<8x128xf32>
    %66 = arith.addf %61, %4 : vector<8x128xf32>
    %67 = arith.subf %66, %63 : vector<8x128xf32>
    %68 = math.exp %67 : vector<8x128xf32>
    %69 = arith.mulf %68, %2 : vector<8x128xf32>
    %70 = arith.mulf %65, %53 : vector<8x128xf32>
    %71 = arith.addf %69, %70 : vector<8x128xf32>
    %72 = arith.mulf %68, %3 : vector<8x128xf32>
    %73 = arith.addf %72, %65 : vector<8x128xf32>
    %74 = arith.mulf %59, %71 : vector<8x128xf32>
    %75 = tpu.reciprocal %73 {approx = true} : vector<8x128xf32> -> vector<8x128xf32>
    %76 = arith.mulf %74, %75 : vector<8x128xf32>
    %c0_37 = arith.constant 0 : index
    %c0_38 = arith.constant 0 : index
    %77 = vector.load %arg9[%c0_37, %c0_38] : memref<128x128xf32, #tpu.memory_space<vmem>>, vector<128x128xf32>
    %c0_39 = arith.constant 0 : index
    %c0_40 = arith.constant 0 : index
    %78 = vector.load %arg10[%c0_39, %c0_40] : memref<128x128xf32, #tpu.memory_space<vmem>>, vector<128x128xf32>
    %cst_41 = arith.constant dense<0.000000e+00> : vector<8x128xf32>
    %79 = tpu.matmul %76, %77, %cst_41 {dimension_numbers = #tpu.dot_dimension_numbers<[1], [0], [0], [1], [0, 0, 1, 1], [], []>} : vector<8x128xf32>, vector<128x128xf32>, vector<8x128xf32> -> vector<8x128xf32>
    %cst_42 = arith.constant dense<0.000000e+00> : vector<8x128xf32>
    %80 = tpu.matmul %79, %78, %cst_42 {dimension_numbers = #tpu.dot_dimension_numbers<[1], [0], [0], [1], [0, 0, 1, 1], [], []>} : vector<8x128xf32>, vector<128x128xf32>, vector<8x128xf32> -> vector<8x128xf32>
    %81 = arith.subf %76, %80 : vector<8x128xf32>
    %82 = arith.mulf %81, %81 : vector<8x128xf32>
    %cst_43 = arith.constant dense<0.000000e+00> : vector<8x128xf32>
    %83 = tpu.matmul %82, %77, %cst_43 {dimension_numbers = #tpu.dot_dimension_numbers<[1], [0], [0], [1], [0, 0, 1, 1], [], []>} : vector<8x128xf32>, vector<128x128xf32>, vector<8x128xf32> -> vector<8x128xf32>
    %cst_44 = arith.constant 9.99999974E-6 : f32
    %84 = vector.broadcast %cst_44 : f32 to vector<8x128xf32>
    %85 = arith.addf %83, %84 : vector<8x128xf32>
    %86 = math.rsqrt %85 : vector<8x128xf32>
    %cst_45 = arith.constant dense<0.000000e+00> : vector<8x128xf32>
    %87 = tpu.matmul %86, %78, %cst_45 {dimension_numbers = #tpu.dot_dimension_numbers<[1], [0], [0], [1], [0, 0, 1, 1], [], []>} : vector<8x128xf32>, vector<128x128xf32>, vector<8x128xf32> -> vector<8x128xf32>
    %88 = arith.mulf %81, %87 : vector<8x128xf32>
    %89 = vector.broadcast %7 : vector<1x128xf32> to vector<8x128xf32>
    %90 = arith.mulf %88, %89 : vector<8x128xf32>
    %91 = vector.broadcast %8 : vector<1x128xf32> to vector<8x128xf32>
    %92 = arith.addf %90, %91 : vector<8x128xf32>
    %93 = arith.truncf %92 : vector<8x128xf32> to vector<8x128xbf16>
    %c0_46 = arith.constant 0 : index
    %c0_47 = arith.constant 0 : index
    %94 = vector.load %arg12[%c0_46, %c0_47] : memref<128x512xbf16, #tpu.memory_space<vmem>>, vector<128x512xbf16>
    %cst_48 = arith.constant dense<0.000000e+00> : vector<8x512xf32>
    %95 = tpu.matmul %93, %94, %cst_48 {dimension_numbers = #tpu.dot_dimension_numbers<[1], [0], [0], [1], [0, 0, 1, 1], [], []>} : vector<8x128xbf16>, vector<128x512xbf16>, vector<8x512xf32> -> vector<8x512xf32>
    %96 = vector.broadcast %10 : vector<1x512xf32> to vector<8x512xf32>
    %97 = arith.addf %95, %96 : vector<8x512xf32>
    %98 = vector.extract_strided_slice %97 {offsets = [0, 0], sizes = [8, 256], strides = [1, 1]} : vector<8x512xf32> to vector<8x256xf32>
    %99 = vector.extract_strided_slice %97 {offsets = [0, 256], sizes = [8, 256], strides = [1, 1]} : vector<8x512xf32> to vector<8x256xf32>
    %cst_49 = arith.constant 5.000000e-01 : f32
    %100 = vector.broadcast %cst_49 : f32 to vector<8x256xf32>
    %101 = arith.mulf %100, %99 : vector<8x256xf32>
    %cst_50 = arith.constant 0.707106769 : f32
    %102 = vector.broadcast %cst_50 : f32 to vector<8x256xf32>
    %103 = arith.mulf %99, %102 : vector<8x256xf32>
    %cst_51 = arith.constant 0.000000e+00 : f32
    %104 = vector.broadcast %cst_51 : f32 to vector<8x256xf32>
    %105 = arith.cmpf oge, %103, %104 : vector<8x256xf32>
    %cst_52 = arith.constant 1.000000e+00 : f32
    %cst_53 = arith.constant -1.000000e+00 : f32
    %106 = vector.broadcast %cst_52 : f32 to vector<8x256xf32>
    %107 = vector.broadcast %cst_53 : f32 to vector<8x256xf32>
    %108 = arith.select %105, %106, %107 : vector<8x256xi1>, vector<8x256xf32>
    %109 = math.absf %103 : vector<8x256xf32>
    %cst_54 = arith.constant 0.327591091 : f32
    %110 = vector.broadcast %cst_54 : f32 to vector<8x256xf32>
    %111 = arith.mulf %110, %109 : vector<8x256xf32>
    %cst_55 = arith.constant 1.000000e+00 : f32
    %112 = vector.broadcast %cst_55 : f32 to vector<8x256xf32>
    %113 = arith.addf %112, %111 : vector<8x256xf32>
    %cst_56 = arith.constant 1.000000e+00 : f32
    %114 = vector.broadcast %cst_56 : f32 to vector<8x256xf32>
    %115 = arith.divf %114, %113 : vector<8x256xf32>
    %cst_57 = arith.constant 1.06140542 : f32
    %116 = vector.broadcast %cst_57 : f32 to vector<8x256xf32>
    %117 = arith.mulf %115, %116 : vector<8x256xf32>
    %cst_58 = arith.constant -1.45315206 : f32
    %118 = vector.broadcast %cst_58 : f32 to vector<8x256xf32>
    %119 = arith.addf %118, %117 : vector<8x256xf32>
    %120 = arith.mulf %115, %119 : vector<8x256xf32>
    %cst_59 = arith.constant 1.42141378 : f32
    %121 = vector.broadcast %cst_59 : f32 to vector<8x256xf32>
    %122 = arith.addf %121, %120 : vector<8x256xf32>
    %123 = arith.mulf %115, %122 : vector<8x256xf32>
    %cst_60 = arith.constant -0.284496725 : f32
    %124 = vector.broadcast %cst_60 : f32 to vector<8x256xf32>
    %125 = arith.addf %124, %123 : vector<8x256xf32>
    %126 = arith.mulf %115, %125 : vector<8x256xf32>
    %cst_61 = arith.constant 0.254829586 : f32
    %127 = vector.broadcast %cst_61 : f32 to vector<8x256xf32>
    %128 = arith.addf %127, %126 : vector<8x256xf32>
    %129 = arith.mulf %115, %128 : vector<8x256xf32>
    %cst_62 = arith.constant 0.000000e+00 : f32
    %130 = vector.broadcast %cst_62 : f32 to vector<8x256xf32>
    %131 = arith.subf %130, %109 : vector<8x256xf32>
    %132 = arith.mulf %131, %109 : vector<8x256xf32>
    %133 = math.exp %132 : vector<8x256xf32>
    %134 = arith.mulf %129, %133 : vector<8x256xf32>
    %cst_63 = arith.constant 1.000000e+00 : f32
    %135 = vector.broadcast %cst_63 : f32 to vector<8x256xf32>
    %136 = arith.subf %135, %134 : vector<8x256xf32>
    %137 = arith.mulf %108, %136 : vector<8x256xf32>
    %cst_64 = arith.constant 1.000000e+00 : f32
    %138 = vector.broadcast %cst_64 : f32 to vector<8x256xf32>
    %139 = arith.addf %138, %137 : vector<8x256xf32>
    %140 = arith.mulf %101, %139 : vector<8x256xf32>
    %141 = arith.mulf %98, %140 : vector<8x256xf32>
    %142 = arith.truncf %141 : vector<8x256xf32> to vector<8x256xbf16>
    %c0_65 = arith.constant 0 : index
    %c0_66 = arith.constant 0 : index
    %143 = vector.load %arg13[%c0_65, %c0_66] : memref<256x128xbf16, #tpu.memory_space<vmem>>, vector<256x128xbf16>
    %cst_67 = arith.constant dense<0.000000e+00> : vector<8x128xf32>
    %144 = tpu.matmul %142, %143, %cst_67 {dimension_numbers = #tpu.dot_dimension_numbers<[1], [0], [0], [1], [0, 0, 1, 1], [], []>} : vector<8x256xbf16>, vector<256x128xbf16>, vector<8x128xf32> -> vector<8x128xf32>
    %145 = vector.broadcast %11 : vector<1x128xf32> to vector<8x128xf32>
    %146 = arith.addf %144, %145 : vector<8x128xf32>
    %147 = arith.addf %146, %0 : vector<8x128xf32>
    %c0_68 = arith.constant 0 : index
    %c0_69 = arith.constant 0 : index
    %148 = vector.load %arg14[%c0_68, %c0_69] : memref<8x128xf32, #tpu.memory_space<vmem>>, vector<8x128xf32>
    tpu.vector_store %arg14[%c0_68, %c0_69], %147 {strides = array<i32>} : memref<8x128xf32, #tpu.memory_space<vmem>>, vector<8x128xf32>,
    %c0_70 = arith.constant 0 : index
    %c0_71 = arith.constant 0 : index
    %149 = vector.load %arg15[%c0_70, %c0_71] : memref<8x128xf32, #tpu.memory_space<vmem>>, vector<8x128xf32>
    tpu.vector_store %arg15[%c0_70, %c0_71], %76 {strides = array<i32>} : memref<8x128xf32, #tpu.memory_space<vmem>>, vector<8x128xf32>,
    %c0_72 = arith.constant 0 : index
    %c0_73 = arith.constant 0 : index
    %150 = vector.load %arg16[%c0_72, %c0_73] : memref<8x128xf32, #tpu.memory_space<vmem>>, vector<8x128xf32>
    tpu.vector_store %arg16[%c0_72, %c0_73], %71 {strides = array<i32>} : memref<8x128xf32, #tpu.memory_space<vmem>>, vector<8x128xf32>,
    %c0_74 = arith.constant 0 : index
    %c0_75 = arith.constant 0 : index
    %151 = vector.load %arg17[%c0_74, %c0_75] : memref<8x128xf32, #tpu.memory_space<vmem>>, vector<8x128xf32>
    tpu.vector_store %arg17[%c0_74, %c0_75], %73 {strides = array<i32>} : memref<8x128xf32, #tpu.memory_space<vmem>>, vector<8x128xf32>,
    %c0_76 = arith.constant 0 : index
    %c0_77 = arith.constant 0 : index
    %152 = vector.load %arg18[%c0_76, %c0_77] : memref<8x128xf32, #tpu.memory_space<vmem>>, vector<8x128xf32>
    tpu.vector_store %arg18[%c0_76, %c0_77], %63 {strides = array<i32>} : memref<8x128xf32, #tpu.memory_space<vmem>>, vector<8x128xf32>,
    return
  }
  func.func @transform_0(%arg0: i32) -> (i32, i32) {
    %c0_i32 = arith.constant 0 : i32
    %c0_i32_0 = arith.constant 0 : i32
    return %arg0, %c0_i32 : i32, i32
  }
  func.func @transform_1(%arg0: i32) -> (i32, i32) {
    %c0_i32 = arith.constant 0 : i32
    %c0_i32_0 = arith.constant 0 : i32
    return %arg0, %c0_i32 : i32, i32
  }
  func.func @transform_2(%arg0: i32) -> (i32, i32) {
    %c0_i32 = arith.constant 0 : i32
    %c0_i32_0 = arith.constant 0 : i32
    return %arg0, %c0_i32 : i32, i32
  }
  func.func @transform_3(%arg0: i32) -> (i32, i32) {
    %c0_i32 = arith.constant 0 : i32
    %c0_i32_0 = arith.constant 0 : i32
    return %arg0, %c0_i32 : i32, i32
  }
  func.func @transform_4(%arg0: i32) -> (i32, i32) {
    %c0_i32 = arith.constant 0 : i32
    %c0_i32_0 = arith.constant 0 : i32
    return %arg0, %c0_i32 : i32, i32
  }
  func.func @transform_5(%arg0: i32) -> i32 {
    %c0_i32 = arith.constant 0 : i32
    %c0_i32_0 = arith.constant 0 : i32
    return %c0_i32 : i32
  }
  func.func @transform_6(%arg0: i32) -> (i32, i32) {
    %c0_i32 = arith.constant 0 : i32
    %c0_i32_0 = arith.constant 0 : i32
    %c0_i32_1 = arith.constant 0 : i32
    return %c0_i32, %c0_i32_0 : i32, i32
  }
  func.func @transform_7(%arg0: i32) -> (i32, i32) {
    %c0_i32 = arith.constant 0 : i32
    %c0_i32_0 = arith.constant 0 : i32
    %c0_i32_1 = arith.constant 0 : i32
    return %c0_i32, %c0_i32_0 : i32, i32
  }
  func.func @transform_8(%arg0: i32) -> (i32, i32) {
    %c0_i32 = arith.constant 0 : i32
    %c0_i32_0 = arith.constant 0 : i32
    %c0_i32_1 = arith.constant 0 : i32
    return %c0_i32, %c0_i32_0 : i32, i32
  }
  func.func @transform_9(%arg0: i32) -> (i32, i32) {
    %c0_i32 = arith.constant 0 : i32
    %c0_i32_0 = arith.constant 0 : i32
    %c0_i32_1 = arith.constant 0 : i32
    return %c0_i32, %c0_i32_0 : i32, i32
  }
  func.func @transform_10(%arg0: i32) -> (i32, i32) {
    %c0_i32 = arith.constant 0 : i32
    %c0_i32_0 = arith.constant 0 : i32
    %c0_i32_1 = arith.constant 0 : i32
    return %c0_i32, %c0_i32_0 : i32, i32
  }
  func.func @transform_11(%arg0: i32) -> (i32, i32) {
    %c0_i32 = arith.constant 0 : i32
    %c0_i32_0 = arith.constant 0 : i32
    %c0_i32_1 = arith.constant 0 : i32
    return %c0_i32, %c0_i32_0 : i32, i32
  }
  func.func @transform_12(%arg0: i32) -> (i32, i32) {
    %c0_i32 = arith.constant 0 : i32
    %c0_i32_0 = arith.constant 0 : i32
    %c0_i32_1 = arith.constant 0 : i32
    return %c0_i32, %c0_i32_0 : i32, i32
  }
  func.func @transform_13(%arg0: i32) -> (i32, i32) {
    %c0_i32 = arith.constant 0 : i32
    %c0_i32_0 = arith.constant 0 : i32
    return %arg0, %c0_i32 : i32, i32
  }
  func.func @transform_14(%arg0: i32) -> (i32, i32) {
    %c0_i32 = arith.constant 0 : i32
    %c0_i32_0 = arith.constant 0 : i32
    return %arg0, %c0_i32 : i32, i32
  }
  func.func @transform_15(%arg0: i32) -> (i32, i32) {
    %c0_i32 = arith.constant 0 : i32
    %c0_i32_0 = arith.constant 0 : i32
    return %arg0, %c0_i32 : i32, i32
  }
  func.func @transform_16(%arg0: i32) -> (i32, i32) {
    %c0_i32 = arith.constant 0 : i32
    %c0_i32_0 = arith.constant 0 : i32
    return %arg0, %c0_i32 : i32, i32
  }
  func.func @transform_17(%arg0: i32) -> (i32, i32) {
    %c0_i32 = arith.constant 0 : i32
    %c0_i32_0 = arith.constant 0 : i32
    return %arg0, %c0_i32 : i32, i32
  }
}

</mosaic_0001>

<bundles_post_ra>
// kernel: slstm_block_forward.1
= control target key start
LH: loop header
LB: loop body
LE: loop exit
PB: predicated region body
PF: predicated region fallthrough
CT: control target
= control target key end

     0   :  { %s3553_s0 = inlined_call_operand.vmem [shape: f32[8,128], index: 0, kind: input, shape index: {}]   ;;  %s3554_s1 = inlined_call_operand.vmem [shape: f32[8,128], index: 1, kind: input, shape index: {}]   ;;  %s3555_s2 = inlined_call_operand.hbm [shape: f32[8,128], index: 2, kind: input, shape index: {}]   ;;  %s3556_s3 = inlined_call_operand.hbm [shape: f32[8,128], index: 3, kind: input, shape index: {}]   ;;  %s3557_s4 = inlined_call_operand.hbm [shape: f32[8,128], index: 4, kind: input, shape index: {}]   ;;  %s3558_s5 = inlined_call_operand.hbm [shape: f32[8], index: 5, kind: input, shape index: {}]   ;;  %s3559_s6 = inlined_call_operand.hbm [shape: f32[128,128], index: 6, kind: input, shape index: {}]   ;;  %s3560_s7 = inlined_call_operand.hbm [shape: f32[1,1664], index: 7, kind: input, shape index: {}]   ;;  %s3561_s8 = inlined_call_operand.hbm [shape: f32[128,128], index: 8, kind: input, shape index: {}]   ;;  %s3562_s9 = inlined_call_operand.hbm [shape: f32[128,128], index: 9, kind: input, shape index: {}]   ;;  %s3563_s10 = inlined_call_operand.hbm [shape: bf16[384,512], index: 10, kind: input, shape index: {}]   ;;  %s3564_s11 = inlined_call_operand.hbm [shape: bf16[128,512], index: 11, kind: input, shape index: {}]   ;;  %s3565_s12 = inlined_call_operand.hbm [shape: bf16[256,128], index: 12, kind: input, shape index: {}]   ;;  %s3566_s13 = inlined_call_operand.hbm [shape: f32[8,128], index: 13, kind: output, shape index: {0}]   ;;  %s3567_s14 = inlined_call_operand.hbm [shape: f32[8,128], index: 14, kind: output, shape index: {1}]   ;;  %s3568_s15 = inlined_call_operand.hbm [shape: f32[8,128], index: 15, kind: output, shape index: {2}]   ;;  %s3569_s16 = inlined_call_operand.hbm [shape: f32[8,128], index: 16, kind: output, shape index: {3}]   ;;  %s3570_s17 = inlined_call_operand.hbm [shape: f32[8,128], index: 17, kind: output, shape index: {4}]  }
   0x1   :  { %3573 = sst [smem:[#allocation39_spill]] %s3553_s0 }
   0x2   :  { %3574 = sst [smem:[#allocation40_spill]] %s3554_s1 }
   0x3   :  { %23 = vsyncpa [#allocation4], 0 }
   0x4   :  { %24 = vsyncpa [#allocation8], 0 }
   0x5   :  { %25 = vsyncpa [#allocation6], 0 }
   0x6   :  { %26 = vsyncpa [#allocation12], 0 }
   0x7   :  { %27 = vsyncpa [#allocation15], 0 }
   0x8   :  { %28 = vsyncpa [#allocation18], 0 }
   0x9   :  { %29 = vsyncpa [#allocation21], 0 }
   0xa   :  { %30 = vsyncpa [#allocation5], 0 }
   0xb   :  { %31 = vsyncpa [#allocation24], 0 }
   0xc   :  { %32 = vsyncpa [#allocation27], 0  ;;  %s3082_s24 = smov [#allocation7]   ;;  %s3083_s26 = smov [#allocation11]  }
   0xd   :  { %s53_s25 = sshll.u32 %s3082_s24, 4  ;;  %s80_s27 = sshll.u32 %s3083_s26, 4  ;;  %s54_s25 = int_to_ptr.vmem [resolvable:$true] %s53_s25  ;;  %s81_s27 = int_to_ptr.vmem [resolvable:$true] %s80_s27 }
   0xe   :  { %s2762_s28 = scalar_lea.vmem %s54_s25, 128  ;;  %p2767_p1 = scmp.lt.s32.totalorder %s54_s25, %s54_s25 }
   0xf   :  { %p2763_p0 = scmp.ne.s32.totalorder %s54_s25, %s2762_s28  ;;  %p2768_p2 = scmp.lt.s32.totalorder %s2762_s28, %s2762_s28 }
  0x11   :  { %p2769_p3 = por %p2768_p2, %p2767_p1 }
  0x13   :  { %p2770_p4 = pnand %p2769_p3, %p2763_p0 }
  0x15   :  { %2773 = shalt.err (!%p2770_p4)
}
  0x16   :  { %56 = dma.hbm_to_vmem [thread:$0]  %s3556_s3, 128, %s54_s25, [#allocation8]  }
  0x17   :  { %s2782_s30 = scalar_lea.vmem %s81_s27, 2048  ;;  %p2787_p6 = scmp.lt.s32.totalorder %s81_s27, %s81_s27 }
  0x18   :  { %p2783_p5 = scmp.ne.s32.totalorder %s81_s27, %s2782_s30  ;;  %p2788_p7 = scmp.lt.s32.totalorder %s2782_s30, %s2782_s30 }
  0x1a   :  { %p2789_p8 = por %p2788_p7, %p2787_p6 }
  0x1c   :  { %p2790_p9 = pnand %p2789_p8, %p2783_p5 }
  0x1e   :  { %2793 = shalt.err (!%p2790_p9)
}
  0x1f   :  { %s3084_s18 = smov 128   ;;  %s3085_s19 = smov 8  }
  0x20   :  { %86 = dma.hbm_to_vmem [thread:$0]  %s3559_s6, 2048, %s81_s27, [#allocation12], %s3084_s18, %s3084_s18, %s3085_s19  }
  0x21   :  { %s3086_s21 = smov [#allocation14]   ;;  %s3087_s23 = smov [#allocation17]  }
  0x22   :  { %s102_s22 = sshll.u32 %s3086_s21, 4  ;;  %s126_s3 = sshll.u32 %s3087_s23, 4  ;;  %s103_s22 = int_to_ptr.vmem [resolvable:$true] %s102_s22  ;;  %s127_s3 = int_to_ptr.vmem [resolvable:$true] %s126_s3 }
  0x23   :  { %s2802_s24 = scalar_lea.vmem %s103_s22, 2048  ;;  %p2807_p11 = scmp.lt.s32.totalorder %s103_s22, %s103_s22 }
  0x24   :  { %p2803_p10 = scmp.ne.s32.totalorder %s103_s22, %s2802_s24  ;;  %p2808_p12 = scmp.lt.s32.totalorder %s2802_s24, %s2802_s24 }
  0x26   :  { %p2809_p13 = por %p2808_p12, %p2807_p11 }
  0x28   :  { %p2810_p0 = pnand %p2809_p13, %p2803_p10 }
  0x2a   :  { %2813 = shalt.err (!%p2810_p0)
}
  0x2b   :  { %108 = dma.hbm_to_vmem [thread:$0]  %s3561_s8, 2048, %s103_s22, [#allocation15], %s3084_s18, %s3084_s18, %s3085_s19  }
  0x2c   :  { %s2822_s6 = scalar_lea.vmem %s127_s3, 12288  ;;  %p2827_p2 = scmp.lt.s32.totalorder %s127_s3, %s127_s3 }
  0x2d   :  { %p2823_p1 = scmp.ne.s32.totalorder %s127_s3, %s2822_s6  ;;  %p2828_p3 = scmp.lt.s32.totalorder %s2822_s6, %s2822_s6 }
  0x2f   :  { %p2829_p4 = por %p2828_p3, %p2827_p2 }
  0x31   :  { %p2830_p5 = pnand %p2829_p4, %p2823_p1 }
  0x33   :  { %2833 = shalt.err (!%p2830_p5)
}
  0x34   :  { %s3088_s27 = smov 256   ;;  %s3089_s28 = smov 16  }
  0x35   :  { %132 = dma.hbm_to_vmem [thread:$0]  %s3563_s10, 12288, %s127_s3, [#allocation18], %s3088_s27, %s3088_s27, %s3089_s28  }
  0x36   :  { %s3090_s30 = smov [#allocation3]   ;;  %s3091_s20 = smov [#allocation9]  }
  0x37   :  { %s43_s1 = sshll.u32 %s3090_s30, 4  ;;  %s63_s8 = sshll.u32 %s3091_s20, 4  ;;  %s44_s1 = int_to_ptr.vmem [resolvable:$true] %s43_s1  ;;  %s64_s8 = int_to_ptr.vmem [resolvable:$true] %s63_s8 }
  0x38   :  { %s2842_s21 = scalar_lea.vmem %s44_s1, 128  ;;  %p2847_p7 = scmp.lt.s32.totalorder %s44_s1, %s44_s1 }
  0x39   :  { %p2843_p6 = scmp.ne.s32.totalorder %s44_s1, %s2842_s21  ;;  %p2848_p8 = scmp.lt.s32.totalorder %s2842_s21, %s2842_s21 }
  0x3b   :  { %p2849_p9 = por %p2848_p8, %p2847_p7 }
  0x3d   :  { %p2850_p10 = pnand %p2849_p9, %p2843_p6 }
  0x3f   :  { %2853 = shalt.err (!%p2850_p10)
}
  0x40   :  { %46 = dma.hbm_to_vmem [thread:$0]  %s3555_s2, 128, %s44_s1, [#allocation4]  }
  0x41   :  { %s2862_s24 = scalar_lea.vmem %s64_s8, 128  ;;  %p2867_p12 = scmp.lt.s32.totalorder %s64_s8, %s64_s8 }
  0x42   :  { %p2863_p11 = scmp.ne.s32.totalorder %s64_s8, %s2862_s24  ;;  %p2868_p13 = scmp.lt.s32.totalorder %s2862_s24, %s2862_s24 }
  0x44   :  { %p2869_p0 = por %p2868_p13, %p2867_p12 }
  0x46   :  { %p2870_p1 = pnand %p2869_p0, %p2863_p11 }
  0x48   :  { %2873 = shalt.err (!%p2870_p1)
}
  0x49   :  { %66 = dma.hbm_to_vmem [thread:$0]  %s3557_s4, 128, %s64_s8, [#allocation8]  }
  0x4a   :  { %s3092_s25 = smov [#allocation10]   ;;  %s3093_s29 = smov [#allocation13]  }
  0x4b   :  { %74 = dma.hbm_to_smem %s3558_s5, 16, %s3092_s25, [#allocation6]  }
  0x4c   :  { %s93_s0 = sshll.u32 %s3093_s29, 4  ;;  %s3094_s2 = smov [#allocation16]   ;;  %s94_s0 = int_to_ptr.vmem [resolvable:$true] %s93_s0 }
  0x4d   :  { %s114_s30 = sshll.u32 %s3094_s2, 4  ;;  %s2890_s1 = scalar_lea.vmem %s94_s0, 208  ;;  %s115_s30 = int_to_ptr.vmem [resolvable:$true] %s114_s30 }
  0x4e   :  { %p2891_p2 = scmp.ne.s32.totalorder %s94_s0, %s2890_s1  ;;  %s2894_s20 = scalar_lea.vmem %s94_s0, 224 }
  0x4f   :  { %p2895_p3 = scmp.lt.s32.totalorder %s94_s0, %s94_s0  ;;  %p2896_p4 = scmp.lt.s32.totalorder %s2894_s20, %s2890_s1 }
  0x51   :  { %p2897_p5 = por %p2896_p4, %p2895_p3 }
  0x53   :  { %p2898_p6 = pnand %p2897_p5, %p2891_p2 }
  0x55   :  { %2901 = shalt.err (!%p2898_p6)
}
  0x56   :  { %96 = dma.hbm_to_vmem [thread:$0]  %s3560_s7, 208, %s94_s0, [#allocation12]  }
  0x57   :  { %s2910_s8 = scalar_lea.vmem %s115_s30, 2048  ;;  %p2915_p8 = scmp.lt.s32.totalorder %s115_s30, %s115_s30 }
  0x58   :  { %p2911_p7 = scmp.ne.s32.totalorder %s115_s30, %s2910_s8  ;;  %p2916_p9 = scmp.lt.s32.totalorder %s2910_s8, %s2910_s8 }
  0x5a   :  { %p2917_p10 = por %p2916_p9, %p2915_p8 }
  0x5c   :  { %p2918_p11 = pnand %p2917_p10, %p2911_p7 }
  0x5e   :  { %2921 = shalt.err (!%p2918_p11)
}
  0x5f   :  { %120 = dma.hbm_to_vmem [thread:$0]  %s3562_s9, 2048, %s115_s30, [#allocation15], %s3084_s18, %s3084_s18, %s3085_s19  }
  0x60   :  { %s3095_s23 = smov [#allocation19]   ;;  %s3096_s10 = smov [#allocation20]  }
  0x61   :  { %s138_s24 = sshll.u32 %s3095_s23, 4  ;;  %s150_s7 = sshll.u32 %s3096_s10, 4  ;;  %s139_s24 = int_to_ptr.vmem [resolvable:$true] %s138_s24  ;;  %s151_s7 = int_to_ptr.vmem [resolvable:$true] %s150_s7 }
  0x62   :  { %s2930_s3 = scalar_lea.vmem %s139_s24, 4096  ;;  %p2935_p13 = scmp.lt.s32.totalorder %s139_s24, %s139_s24 }
  0x63   :  { %p2931_p12 = scmp.ne.s32.totalorder %s139_s24, %s2930_s3  ;;  %p2936_p0 = scmp.lt.s32.totalorder %s2930_s3, %s2930_s3 }
  0x65   :  { %p2937_p1 = por %p2936_p0, %p2935_p13 }
  0x67   :  { %p2938_p2 = pnand %p2937_p1, %p2931_p12 }
  0x69   :  { %2941 = shalt.err (!%p2938_p2)
}
  0x6a   :  { %144 = dma.hbm_to_vmem [thread:$0]  %s3564_s11, 4096, %s139_s24, [#allocation18], %s3088_s27, %s3088_s27, %s3089_s28  }
  0x6b   :  { %s2950_s9 = scalar_lea.vmem %s151_s7, 2048  ;;  %p2955_p4 = scmp.lt.s32.totalorder %s151_s7, %s151_s7 }
  0x6c   :  { %p2951_p3 = scmp.ne.s32.totalorder %s151_s7, %s2950_s9  ;;  %p2956_p5 = scmp.lt.s32.totalorder %s2950_s9, %s2950_s9 }
  0x6e   :  { %p2957_p6 = por %p2956_p5, %p2955_p4 }
  0x70   :  { %p2958_p7 = pnand %p2957_p6, %p2951_p3 }
  0x72   :  { %2961 = shalt.err (!%p2958_p7)
}
  0x73   :  { %s3097_s18 = smov 64   ;;  %s3098_s19 = smov 4  }
  0x74   :  { %156 = dma.hbm_to_vmem [thread:$0]  %s3565_s12, 2048, %s151_s7, [#allocation21], %s3097_s18, %s3097_s18, %s3098_s19  }
  0x75   :  { %3062 = dma.done.wait [#allocation4], 128  }
  0x76   :  { %3063 = vsyncadd [#allocation4], 4294967168 }
  0x77   :  { %3064 = dma.done.wait [#allocation8], 256  }
  0x78   :  { %3065 = vsyncadd [#allocation8], 4294967040 }
  0x79   :  { %3066 = dma.done.wait [#allocation6], 16  }
  0x7a   :  { %3067 = vsyncadd [#allocation6], 4294967280 }
  0x7b   :  { %3068 = dma.done.wait [#allocation12], 2256  }
  0x7c   :  { %3069 = vsyncadd [#allocation12], 4294965040 }
  0x7d   :  { %3070 = dma.done.wait [#allocation15], 4096  }
  0x7e   :  { %3071 = vsyncadd [#allocation15], 4294963200 }
  0x7f   :  { %3072 = dma.done.wait [#allocation18], 16384  }
  0x80   :  { %3073 = vsyncadd [#allocation18], 4294950912 }
  0x81   :  { %3074 = dma.done.wait [#allocation21], 2048  }
  0x82   :  { %3075 = vsyncadd [#allocation21], 4294965248 }
  0x83   :  { %190 = sfence }
  0x84   :  { %s3575_s28 = sld [smem:[#allocation39_spill]]  ;;  %v246_v1 = vld [vmem:[#allocation11 + $0x78] sm:$0xff]  ;;  %v245_v2 = vld [vmem:[#allocation11 + $0x70] sm:$0xff]  ;;  %v3099_v3 = vmov 0.0   ;;  %v244_v4 = vld [vmem:[#allocation11 + $0x68] sm:$0xff]  ;;  %vm3100_vm0 = vmmov 0  }
  0x85   :  { %2316 = vmatprep.subr.mxu0 %v3099_v3  ;;  %v243_v5 = vld [vmem:[#allocation11 + $0x60] sm:$0xff]  ;;  %v242_v10 = vld [vmem:[#allocation11 + $0x58] sm:$0xff]  ;;  %v241_v11 = vld [vmem:[#allocation11 + $0x50] sm:$0xff]  ;;  %2348 = vmatprep.mubr.msk.f32.mxu0 %vm3100_vm0, %v3099_v3  ;;  %v3101_v48 = vmov 0   ;;  %s3576_s2 = sld [smem:[#allocation40_spill]]  ;;  %s3103_s1 = smov [#allocation23]  }
  0x86   :  { %2317 = vmatpush3.msra.mxu0 %v246_v1  ;;  %v240_v12 = vld [vmem:[#allocation11 + $0x48] sm:$0xff]  ;;  %v239_v13 = vld [vmem:[#allocation11 + $0x40] sm:$0xff]  ;;  %v238_v14 = vld [vmem:[#allocation11 + $0x38] sm:$0xff]  ;;  %s2059_s30 = sld [smem:[#allocation10 + $0x4]]  ;;  %s1998_s20 = sshll.u32 %s3103_s1, 4  ;;  %s1999_s20 = int_to_ptr.vmem [resolvable:$true] %s1998_s20 }
  0x87   :  { %2318 = vmatprep.subr.mxu0 %v3099_v3  ;;  %v237_v15 = vld [vmem:[#allocation11 + $0x30] sm:$0xff]  ;;  %v236_v16 = vld [vmem:[#allocation11 + $0x28] sm:$0xff]  ;;  %v235_v17 = vld [vmem:[#allocation11 + $0x20] sm:$0xff]  ;;  %s3104_s21 = smov [#allocation26]   ;;  %s2962_s8 = scalar_lea.vmem %s1999_s20, 128 }
  0x88   :  { %2319 = vmatpush3.msra.mxu0 %v245_v2  ;;  %v234_v18 = vld [vmem:[#allocation11 + $0x18] sm:$0xff]  ;;  %v233_v19 = vld [vmem:[#allocation11 + $0x10] sm:$0xff]  ;;  %v232_v20 = vld [vmem:[#allocation11 + $0x8] sm:$0xff]  ;;  %s2018_s4 = sshll.u32 %s3104_s21, 4  ;;  %p2963_p8 = scmp.ne.s32.totalorder %s1999_s20, %s2962_s8  ;;  %s2019_s4 = int_to_ptr.vmem [resolvable:$true] %s2018_s4 }
  0x89   :  { %2320 = vmatprep.subr.mxu0 %v3099_v3  ;;  %v231_v21 = vld [vmem:[#allocation11] sm:$0xff]  ;;  %v2563_v61 = vld [vmem:[#allocation17 + $0xec] ss:$16 sps:$4 sm:$0xff]   ;;  %p2967_p9 = scmp.lt.s32.totalorder %s1999_s20, %s1999_s20  ;;  %p2968_p10 = scmp.lt.s32.totalorder %s2962_s8, %s2962_s8 }
  0x8a   :  { %v3249_v0 = vld [vmem:[%s3575_s28] sm:$0xff]  ;;  %2321 = vmatpush3.msra.mxu0 %v244_v4  ;;  %v2519_v22 = vld [vmem:[#allocation17 + $0x2e4] ss:$16 sps:$4 sm:$0xff]   ;;  %v2057_v40 = vld [vmem:[#allocation13] ss:$0 sm:$0xff] }
  0x8b   :  { %204 = vadd.xlane.f32.xlu0 %v3249_v0  ;;  %2322 = vmatprep.subr.mxu0 %v3099_v3  ;;  %v2523_v23 = vld [vmem:[#allocation17 + $0xe4] ss:$16 sps:$4 sm:$0xff]   ;;  %v2528_v24 = vld [vmem:[#allocation17 + $0xe0] ss:$16 sps:$4 sm:$0xff]   ;;  %v2561_v62 = vld [vmem:[#allocation17 + $0xe8] ss:$16 sps:$4 sm:$0xff]   ;;  %p2969_p11 = por %p2968_p10, %p2967_p9 }
  0x8c   :  { %2323 = vmatpush3.msra.mxu0 %v243_v5  ;;  %931 = vmatprep.subr.bf16.mxu1 %v2523_v23  ;;  %v2529_v25 = vld [vmem:[#allocation17 + $0xc4] ss:$16 sps:$4 sm:$0xff]   ;;  %v2534_v26 = vld [vmem:[#allocation17 + $0xc0] ss:$16 sps:$4 sm:$0xff]   ;;  %v2569_v5 = vld [vmem:[#allocation17 + $0xcc] ss:$16 sps:$4 sm:$0xff]  }
  0x8d   :  { %2324 = vmatprep.subr.mxu0 %v3099_v3  ;;  %932 = vmatpush1.bf16.msra.mxu1 %v2528_v24  ;;  %v2535_v27 = vld [vmem:[#allocation17 + $0xa4] ss:$16 sps:$4 sm:$0xff]   ;;  %v2540_v28 = vld [vmem:[#allocation17 + $0xa0] ss:$16 sps:$4 sm:$0xff]   ;;  %p2970_p12 = pnand %p2969_p11, %p2963_p8 }
  0x8e   :  { %2325 = vmatpush3.msra.mxu0 %v242_v10  ;;  %933 = vmatprep.subr.bf16.mxu1 %v2529_v25  ;;  %v2541_v29 = vld [vmem:[#allocation17 + $0x84] ss:$16 sps:$4 sm:$0xff]   ;;  %v2546_v30 = vld [vmem:[#allocation17 + $0x80] ss:$16 sps:$4 sm:$0xff]   ;;  %v2573_v10 = vld [vmem:[#allocation17 + $0xa8] ss:$16 sps:$4 sm:$0xff]  }
  0x8f   :  { %2326 = vmatprep.subr.mxu0 %v3099_v3  ;;  %v2547_v31 = vld [vmem:[#allocation17 + $0x64] ss:$16 sps:$4 sm:$0xff]   ;;  %v2552_v32 = vld [vmem:[#allocation17 + $0x60] ss:$16 sps:$4 sm:$0xff]   ;;  %v2597_v25 = vld [vmem:[#allocation17 + $0x28] ss:$16 sps:$4 sm:$0xff]  }
  0x90   :  { %2327 = vmatpush3.msra.mxu0 %v241_v11  ;;  %v2553_v33 = vld [vmem:[#allocation17 + $0x44] ss:$16 sps:$4 sm:$0xff]   ;;  %v2558_v34 = vld [vmem:[#allocation17 + $0x40] ss:$16 sps:$4 sm:$0xff]  }
  0x91   :  { %2328 = vmatprep.subr.mxu0 %v3099_v3  ;;  %934 = vmatpush1.bf16.msra.mxu1 %v2534_v26  ;;  %v2559_v35 = vld [vmem:[#allocation17 + $0x24] ss:$16 sps:$4 sm:$0xff]   ;;  %v2058_v42 = vld [vmem:[#allocation13 + $0x1] ss:$0 sm:$0xff]  ;;  %v193_v63 = vld [vmem:[%s3576_s2] sm:$0xff] }
  0x92   :  { %2329 = vmatpush3.msra.mxu0 %v240_v12  ;;  %935 = vmatprep.subr.bf16.mxu1 %v2535_v27  ;;  %v2517_v44 = vld [vmem:[#allocation17 + $0x2e0] ss:$16 sps:$4 sm:$0xff]   ;;  %v2522_v46 = vld [vmem:[#allocation17 + $0x2c4] ss:$16 sps:$4 sm:$0xff]   ;;  %v3280_v2 = vpack.c.bf16 %v193_v63, %v193_v63  ;;  %v2599_v26 = vld [vmem:[#allocation17 + $0x2c] ss:$16 sps:$4 sm:$0xff]   ;;  %v331_v63 = vpack.c.bf16 %v3249_v0, %v3249_v0 }
  0x93   :  { %2330 = vmatprep.subr.mxu0 %v3099_v3  ;;  %v2520_v47 = vld [vmem:[#allocation17 + $0x2c0] ss:$16 sps:$4 sm:$0xff]   ;;  %v2527_v49 = vld [vmem:[#allocation17 + $0x2a4] ss:$16 sps:$4 sm:$0xff]  }
  0x94   :  { %2331 = vmatpush3.msra.mxu0 %v239_v13  ;;  %v2525_v50 = vld [vmem:[#allocation17 + $0x2a0] ss:$16 sps:$4 sm:$0xff]   ;;  %v2533_v51 = vld [vmem:[#allocation17 + $0x284] ss:$16 sps:$4 sm:$0xff]   ;;  %v2581_v13 = vld [vmem:[#allocation17 + $0x8c] ss:$16 sps:$4 sm:$0xff]  }
  0x95   :  { %2332 = vmatprep.subr.mxu0 %v3099_v3  ;;  %936 = vmatpush1.bf16.msra.mxu1 %v2540_v28  ;;  %v2531_v52 = vld [vmem:[#allocation17 + $0x280] ss:$16 sps:$4 sm:$0xff]   ;;  %v2539_v53 = vld [vmem:[#allocation17 + $0x264] ss:$16 sps:$4 sm:$0xff]  }
  0x96   :  { %2333 = vmatpush3.msra.mxu0 %v238_v14  ;;  %937 = vmatprep.subr.bf16.mxu1 %v2541_v29  ;;  %v2537_v54 = vld [vmem:[#allocation17 + $0x260] ss:$16 sps:$4 sm:$0xff]   ;;  %v2545_v55 = vld [vmem:[#allocation17 + $0x244] ss:$16 sps:$4 sm:$0xff]   ;;  %v2579_v14 = vld [vmem:[#allocation17 + $0x88] ss:$16 sps:$4 sm:$0xff]  }
  0x97   :  { %2334 = vmatprep.subr.mxu0 %v3099_v3  ;;  %v2543_v56 = vld [vmem:[#allocation17 + $0x240] ss:$16 sps:$4 sm:$0xff]   ;;  %v2551_v57 = vld [vmem:[#allocation17 + $0x224] ss:$16 sps:$4 sm:$0xff]   ;;  %v2605_v29 = vld [vmem:[#allocation17 + $0xc] ss:$16 sps:$4 sm:$0xff]  }
  0x98   :  { %2335 = vmatpush3.msra.mxu0 %v237_v15  ;;  %v2549_v58 = vld [vmem:[#allocation17 + $0x220] ss:$16 sps:$4 sm:$0xff]   ;;  %v2557_v59 = vld [vmem:[#allocation17 + $0x204] ss:$16 sps:$4 sm:$0xff]  }
  0x99   :  { %2336 = vmatprep.subr.mxu0 %v3099_v3  ;;  %938 = vmatpush1.bf16.msra.mxu1 %v2546_v30  ;;  %v2555_v60 = vld [vmem:[#allocation17 + $0x200] ss:$16 sps:$4 sm:$0xff]   ;;  %v2565_v4 = vld [vmem:[#allocation17 + $0x4] ss:$16 sps:$4 sm:$0xff]  }
  0x9a   :  { %2337 = vmatpush3.msra.mxu0 %v236_v16  ;;  %939 = vmatprep.subr.bf16.mxu1 %v2547_v31  ;;  %v2564_v1 = vld [vmem:[#allocation17 + $0x20] ss:$16 sps:$4 sm:$0xff]   ;;  %v2577_v12 = vld [vmem:[#allocation17 + $0x1c4] ss:$16 sps:$4 sm:$0xff]   ;;  %v2603_v31 = vld [vmem:[#allocation17 + $0x8] ss:$16 sps:$4 sm:$0xff]  }
  0x9b   :  { %2338 = vmatprep.subr.mxu0 %v3099_v3  ;;  %v2576_v11 = vld [vmem:[#allocation17 + $0x1e0] ss:$16 sps:$4 sm:$0xff]   ;;  %v2583_v16 = vld [vmem:[#allocation17 + $0x1a4] ss:$16 sps:$4 sm:$0xff]  }
  0x9c   :  { %2339 = vmatpush3.msra.mxu0 %v235_v17  ;;  %v2582_v15 = vld [vmem:[#allocation17 + $0x1c0] ss:$16 sps:$4 sm:$0xff]   ;;  %v2587_v17 = vld [vmem:[#allocation17 + $0x6c] ss:$16 sps:$4 sm:$0xff]   ;;  %v2595_v24 = vld [vmem:[#allocation17 + $0x164] ss:$16 sps:$4 sm:$0xff]  }
  0x9d   :  { %2340 = vmatprep.subr.mxu0 %v3099_v3  ;;  %940 = vmatpush1.bf16.msra.mxu1 %v2552_v32  ;;  %v2594_v23 = vld [vmem:[#allocation17 + $0x180] ss:$16 sps:$4 sm:$0xff]   ;;  %v2601_v28 = vld [vmem:[#allocation17 + $0x144] ss:$16 sps:$4 sm:$0xff]  }
  0x9e   :  { %2341 = vmatpush3.msra.mxu0 %v234_v18  ;;  %941 = vmatprep.subr.bf16.mxu1 %v2553_v33  ;;  %v2585_v18 = vld [vmem:[#allocation17 + $0x68] ss:$16 sps:$4 sm:$0xff]   ;;  %v2600_v27 = vld [vmem:[#allocation17 + $0x160] ss:$16 sps:$4 sm:$0xff]   ;;  %v2607_v32 = vld [vmem:[#allocation17 + $0x124] ss:$16 sps:$4 sm:$0xff]  }
  0x9f   :  { %2342 = vmatprep.subr.mxu0 %v3099_v3  ;;  %v2606_v30 = vld [vmem:[#allocation17 + $0x140] ss:$16 sps:$4 sm:$0xff]   ;;  %v2611_v33 = vld [vmem:[#allocation17 + $0x1ec] ss:$16 sps:$4 sm:$0xff]  }
  0xa0   :  { %2343 = vmatpush3.msra.mxu0 %v233_v19  ;;  %v2588_v19 = vld [vmem:[#allocation17 + $0x1a0] ss:$16 sps:$4 sm:$0xff]  }
  0xa1   :  { %2344 = vmatprep.subr.mxu0 %v3099_v3  ;;  %942 = vmatpush1.bf16.msra.mxu1 %v2558_v34  ;;  %v2612_v34 = vld [vmem:[#allocation17 + $0x120] ss:$16 sps:$4 sm:$0xff]  }
  0xa2   :  { %2345 = vmatpush3.msra.mxu0 %v232_v20  ;;  %943 = vmatprep.subr.bf16.mxu1 %v2559_v35  ;;  %v2589_v20 = vld [vmem:[#allocation17 + $0x184] ss:$16 sps:$4 sm:$0xff]   ;;  %v2609_v35 = vld [vmem:[#allocation17 + $0x1e8] ss:$16 sps:$4 sm:$0xff]  }
  0xa3   :  { %2346 = vmatprep.subr.mxu0 %v3099_v3 }
  0xa4   :  { %2347 = vmatpush3.msra.mxu0 %v231_v21  ;;  %v2593_v21 = vld [vmem:[#allocation17 + $0x4c] ss:$16 sps:$4 sm:$0xff]  }
  0xa5   :  { %972 = vmatprep.subr.bf16.mxu0 %v2519_v22  ;;  %944 = vmatpush1.bf16.msra.mxu1 %v2564_v1  ;;  %v2591_v22 = vld [vmem:[#allocation17 + $0x48] ss:$16 sps:$4 sm:$0xff]  }
  0xa6   :  { %945 = vmatprep.subr.bf16.mxu1 %v2565_v4  ;;  %v2622_v4 = vld [vmem:[#allocation17 + $0x2e8] ss:$16 sps:$4 sm:$0xff]  }
 0x114   :  { %v205_v6 = vpop.xlane.xlu0 %204 }
 0x115   :  { %v207_v7 = vmul.f32 0.0078125, %v205_v6  ;;  %v2567_v6 = vld [vmem:[#allocation17 + $0xc8] ss:$16 sps:$4 sm:$0xff]  }
 0x117   :  { %v3258_v8 = vsub.f32 %v3249_v0, %v207_v7  ;;  %v2570_v7 = vld [vmem:[#allocation17] ss:$16 sps:$4 sm:$0xff]   ;;  %v2642_v0 = vld [vmem:[#allocation17 + $0x28c] ss:$16 sps:$4 sm:$0xff]  }
 0x118   :  { %946 = vmatpush1.bf16.msra.mxu1 %v2570_v7  ;;  %v2636_v7 = vld [vmem:[#allocation17 + $0x2ac] ss:$16 sps:$4 sm:$0xff]  }
 0x119   :  { %v209_v9 = vmul.f32 %v3258_v8, %v3258_v8 }
 0x11b   :  { %210 = vadd.xlane.f32.xlu0 %v209_v9  ;;  %v2575_v9 = vld [vmem:[#allocation17 + $0xac] ss:$16 sps:$4 sm:$0xff]  }
 0x1a4   :  { %v211_v36 = vpop.xlane.xlu0 %210 }
 0x1a5   :  { %v212_v37 = vmul.f32 0.0078125, %v211_v36  ;;  %v2613_v36 = vld [vmem:[#allocation17 + $0x104] ss:$16 sps:$4 sm:$0xff]  }
 0x1a7   :  { %v213_v38 = vadd.f32 1e-05, %v212_v37  ;;  %v2617_v37 = vld [vmem:[#allocation17 + $0x1cc] ss:$16 sps:$4 sm:$0xff]  }
 0x1a9   :  { %2725 = vrsqrt.f32 %v213_v38  ;;  %v2618_v38 = vld [vmem:[#allocation17 + $0x100] ss:$16 sps:$4 sm:$0xff]  }
 0x1b6   :  { %v2726_v39 = vpop.eup %2725 }
 0x1b7   :  { %v215_v41 = vmul.f32 %v2726_v39, %v3258_v8  ;;  %v2571_v8 = vld [vmem:[#allocation17 + $0x1e4] ss:$16 sps:$4 sm:$0xff]   ;;  %v2615_v39 = vld [vmem:[#allocation17 + $0x1c8] ss:$16 sps:$4 sm:$0xff]  }
 0x1b8   :  { %947 = vmatprep.subr.bf16.mxu1 %v2571_v8  ;;  %v2634_v8 = vld [vmem:[#allocation17 + $0x2a8] ss:$16 sps:$4 sm:$0xff]  }
 0x1b9   :  { %v222_v43 = vmul.f32 %v2057_v40, %v215_v41  ;;  %948 = vmatpush2.bf16.msra.mxu1 %v2576_v11  ;;  %v2621_v40 = vld [vmem:[#allocation17 + $0x1ac] ss:$16 sps:$4 sm:$0xff]   ;;  %v2646_v11 = vld [vmem:[#allocation17 + $0x268] ss:$16 sps:$4 sm:$0xff]  }
 0x1ba   :  { %949 = vmatprep.subr.bf16.mxu1 %v2577_v12  ;;  %v2624_v41 = vld [vmem:[#allocation17 + $0x2ec] ss:$16 sps:$4 sm:$0xff]  }
 0x1bb   :  { %v229_v45 = vadd.f32 %v2058_v42, %v222_v43  ;;  %v2619_v42 = vld [vmem:[#allocation17 + $0x1a8] ss:$16 sps:$4 sm:$0xff]   ;;  %v2654_v12 = vld [vmem:[#allocation17 + $0x24c] ss:$16 sps:$4 sm:$0xff]  }
 0x1bc   :  { %v2625_v43 = vld [vmem:[#allocation17 + $0x188] ss:$16 sps:$4 sm:$0xff]  }
 0x1bd   :  { %2349 = vmatmul.mubr.f32.vlgmr.msra.gmra.mxu0 %v229_v45  ;;  %950 = vmatpush2.bf16.msra.mxu1 %v2582_v15  ;;  %v2631_v45 = vld [vmem:[#allocation17 + $0x168] ss:$16 sps:$4 sm:$0xff]  }
 0x1be   :  { %973 = vmatpush1.bf16.msra.mxu0 %v2517_v44  ;;  %1004 = vmatprep.mubr.bf16.mxu0 %v3101_v48  ;;  %v2627_v44 = vld [vmem:[#allocation17 + $0x18c] ss:$16 sps:$4 sm:$0xff]   ;;  %v2655_v15 = vld [vmem:[#allocation17 + $0x228] ss:$16 sps:$4 sm:$0xff]  }
 0x1bf   :  { %974 = vmatprep.subr.bf16.mxu0 %v2522_v46  ;;  %951 = vmatprep.subr.bf16.mxu1 %v2583_v16  ;;  %v2633_v46 = vld [vmem:[#allocation17 + $0x16c] ss:$16 sps:$4 sm:$0xff]  }
 0x1c0   :  { %v2660_v16 = vld [vmem:[#allocation17 + $0x20c] ss:$16 sps:$4 sm:$0xff]  }
 0x1c1   :  { %952 = vmatpush2.bf16.msra.mxu1 %v2588_v19 }
 0x1c2   :  { %975 = vmatpush1.bf16.msra.mxu0 %v2520_v47  ;;  %953 = vmatprep.subr.bf16.mxu1 %v2589_v20  ;;  %v2637_v47 = vld [vmem:[#allocation17 + $0x148] ss:$16 sps:$4 sm:$0xff]  }
 0x1c3   :  { %976 = vmatprep.subr.bf16.mxu0 %v2527_v49  ;;  %v2639_v49 = vld [vmem:[#allocation17 + $0x14c] ss:$16 sps:$4 sm:$0xff]  }
 0x1c5   :  { %954 = vmatpush2.bf16.msra.mxu1 %v2594_v23  ;;  %v3301_v23 = vld [vmem:[#allocation14 + $0x70] sm:$0xff] }
 0x1c6   :  { %977 = vmatpush1.bf16.msra.mxu0 %v2525_v50  ;;  %955 = vmatprep.subr.bf16.mxu1 %v2595_v24  ;;  %v2643_v50 = vld [vmem:[#allocation17 + $0x128] ss:$16 sps:$4 sm:$0xff]  }
 0x1c7   :  { %978 = vmatprep.subr.bf16.mxu0 %v2533_v51  ;;  %v2645_v51 = vld [vmem:[#allocation17 + $0x12c] ss:$16 sps:$4 sm:$0xff]  }
 0x1c8   :  { %v3305_v24 = vld [vmem:[#allocation14 + $0x68] sm:$0xff] }
 0x1c9   :  { %956 = vmatpush2.bf16.msra.mxu1 %v2600_v27  ;;  %v3321_v27 = vld [vmem:[#allocation14 + $0x48] sm:$0xff] }
 0x1ca   :  { %979 = vmatpush1.bf16.msra.mxu0 %v2531_v52  ;;  %957 = vmatprep.subr.bf16.mxu1 %v2601_v28  ;;  %v2649_v52 = vld [vmem:[#allocation17 + $0x108] ss:$16 sps:$4 sm:$0xff]   ;;  %v3325_v28 = vld [vmem:[#allocation14 + $0x40] sm:$0xff] }
 0x1cb   :  { %980 = vmatprep.subr.bf16.mxu0 %v2539_v53  ;;  %v2651_v53 = vld [vmem:[#allocation17 + $0x10c] ss:$16 sps:$4 sm:$0xff]  }
 0x1cd   :  { %958 = vmatpush2.bf16.msra.mxu1 %v2606_v30  ;;  %v3331_v30 = vld [vmem:[#allocation14 + $0x30] sm:$0xff] }
 0x1ce   :  { %981 = vmatpush1.bf16.msra.mxu0 %v2537_v54  ;;  %959 = vmatprep.subr.bf16.mxu1 %v2607_v32  ;;  %v247_v54 = vstv %s2059_s30  ;;  %v3339_v32 = vld [vmem:[#allocation14 + $0x20] sm:$0xff] }
 0x1cf   :  { %982 = vmatprep.subr.bf16.mxu0 %v2545_v55 }
 0x1d1   :  { %960 = vmatpush2.bf16.msra.mxu1 %v2612_v34  ;;  %v3347_v34 = vld [vmem:[#allocation14 + $0x10] sm:$0xff] }
 0x1d2   :  { %983 = vmatpush1.bf16.msra.mxu0 %v2543_v56  ;;  %961 = vmatprep.subr.bf16.mxu1 %v2613_v36  ;;  %v3355_v36 = vld [vmem:[#allocation14] sm:$0xff] }
 0x1d3   :  { %984 = vmatprep.subr.bf16.mxu0 %v2551_v57 }
 0x1d5   :  { %962 = vmatpush2.bf16.msra.mxu1 %v2618_v38  ;;  %v3362_v38 = vld [vmem:[#allocation16 + $0x70] sm:$0xff] }
 0x1d6   :  { %985 = vmatpush1.bf16.msra.mxu0 %v2549_v58  ;;  %1054 = vmatprep.subr.bf16.mxu1 %v2624_v41  ;;  %v3375_v41 = vld [vmem:[#allocation16 + $0x58] sm:$0xff] }
 0x1d7   :  { %986 = vmatprep.subr.bf16.mxu0 %v2557_v59 }
 0x1da   :  { %987 = vmatpush1.bf16.msra.mxu0 %v2555_v60 }
 0x1db   :  { %1013 = vmatprep.subr.bf16.mxu0 %v2563_v61 }
 0x1dd   :  { %1005 = vmatmul.mubr.bf16.vlgmr.msra.gmra.mxu0 %v3280_v2 }
 0x1de   :  { %1014 = vmatpush1.bf16.msra.mxu0 %v2561_v62 }
 0x1df   :  { %1015 = vmatprep.subr.bf16.mxu0 %v2569_v5  ;;  %v2630_v5 = vld [vmem:[#allocation17 + $0x2cc] ss:$16 sps:$4 sm:$0xff]  }
 0x1e2   :  { %1016 = vmatpush1.bf16.msra.mxu0 %v2567_v6  ;;  %v2628_v6 = vld [vmem:[#allocation17 + $0x2c8] ss:$16 sps:$4 sm:$0xff]  }
 0x1e3   :  { %1017 = vmatprep.subr.bf16.mxu0 %v2575_v9  ;;  %v2640_v9 = vld [vmem:[#allocation17 + $0x288] ss:$16 sps:$4 sm:$0xff]  }
 0x1e6   :  { %1018 = vmatpush1.bf16.msra.mxu0 %v2573_v10  ;;  %v2648_v10 = vld [vmem:[#allocation17 + $0x26c] ss:$16 sps:$4 sm:$0xff]  }
 0x1e7   :  { %1019 = vmatprep.subr.bf16.mxu0 %v2581_v13  ;;  %v2652_v13 = vld [vmem:[#allocation17 + $0x248] ss:$16 sps:$4 sm:$0xff]  }
 0x1ea   :  { %1020 = vmatpush1.bf16.msra.mxu0 %v2579_v14  ;;  %v2657_v14 = vld [vmem:[#allocation17 + $0x22c] ss:$16 sps:$4 sm:$0xff]  }
 0x1eb   :  { %1021 = vmatprep.subr.bf16.mxu0 %v2587_v17 }
 0x1ee   :  { %1022 = vmatpush1.bf16.msra.mxu0 %v2585_v18  ;;  %v2658_v18 = vld [vmem:[#allocation17 + $0x208] ss:$16 sps:$4 sm:$0xff]  }
 0x1ef   :  { %1023 = vmatprep.subr.bf16.mxu0 %v2593_v21 }
 0x1f2   :  { %1024 = vmatpush1.bf16.msra.mxu0 %v2591_v22  ;;  %v3297_v22 = vld [vmem:[#allocation14 + $0x78] sm:$0xff] }
 0x1f3   :  { %1025 = vmatprep.subr.bf16.mxu0 %v2599_v26  ;;  %v3317_v26 = vld [vmem:[#allocation14 + $0x50] sm:$0xff] }
 0x1f6   :  { %1026 = vmatpush1.bf16.msra.mxu0 %v2597_v25  ;;  %v3313_v25 = vld [vmem:[#allocation14 + $0x58] sm:$0xff] }
 0x1f7   :  { %1027 = vmatprep.subr.bf16.mxu0 %v2605_v29  ;;  %v3329_v29 = vld [vmem:[#allocation14 + $0x38] sm:$0xff] }
 0x1fa   :  { %1028 = vmatpush1.bf16.msra.mxu0 %v2603_v31  ;;  %v3335_v31 = vld [vmem:[#allocation14 + $0x28] sm:$0xff] }
 0x1fb   :  { %1029 = vmatprep.subr.bf16.mxu0 %v2611_v33  ;;  %v3343_v33 = vld [vmem:[#allocation14 + $0x18] sm:$0xff] }
 0x1fe   :  { %1030 = vmatpush2.bf16.msra.mxu0 %v2609_v35  ;;  %v3351_v35 = vld [vmem:[#allocation14 + $0x8] sm:$0xff] }
 0x1ff   :  { %1031 = vmatprep.subr.bf16.mxu0 %v2617_v37  ;;  %v3360_v37 = vld [vmem:[#allocation16 + $0x78] sm:$0xff] }
 0x202   :  { %1032 = vmatpush2.bf16.msra.mxu0 %v2615_v39  ;;  %v3367_v39 = vld [vmem:[#allocation16 + $0x68] sm:$0xff] }
 0x203   :  { %1033 = vmatprep.subr.bf16.mxu0 %v2621_v40  ;;  %v3371_v40 = vld [vmem:[#allocation16 + $0x60] sm:$0xff] }
 0x206   :  { %1034 = vmatpush2.bf16.msra.mxu0 %v2619_v42  ;;  %v3379_v42 = vld [vmem:[#allocation16 + $0x50] sm:$0xff] }
 0x207   :  { %1035 = vmatprep.subr.bf16.mxu0 %v2627_v44  ;;  %v3387_v44 = vld [vmem:[#allocation16 + $0x40] sm:$0xff] }
 0x20a   :  { %1036 = vmatpush2.bf16.msra.mxu0 %v2625_v43  ;;  %v3383_v43 = vld [vmem:[#allocation16 + $0x48] sm:$0xff] }
 0x20b   :  { %1037 = vmatprep.subr.bf16.mxu0 %v2633_v46  ;;  %v3395_v46 = vld [vmem:[#allocation16 + $0x30] sm:$0xff] }
 0x20e   :  { %1038 = vmatpush2.bf16.msra.mxu0 %v2631_v45  ;;  %v3391_v45 = vld [vmem:[#allocation16 + $0x38] sm:$0xff] }
 0x20f   :  { %1039 = vmatprep.subr.bf16.mxu0 %v2639_v49  ;;  %v3403_v49 = vld [vmem:[#allocation16 + $0x20] sm:$0xff] }
 0x212   :  { %1040 = vmatpush2.bf16.msra.mxu0 %v2637_v47  ;;  %v3399_v47 = vld [vmem:[#allocation16 + $0x28] sm:$0xff] }
 0x213   :  { %1041 = vmatprep.subr.bf16.mxu0 %v2645_v51  ;;  %v3411_v51 = vld [vmem:[#allocation16 + $0x10] sm:$0xff] }
 0x216   :  { %1042 = vmatpush2.bf16.msra.mxu0 %v2643_v50  ;;  %v3407_v50 = vld [vmem:[#allocation16 + $0x18] sm:$0xff] }
 0x217   :  { %1043 = vmatprep.subr.bf16.mxu0 %v2651_v53 }
 0x21a   :  { %1044 = vmatpush2.bf16.msra.mxu0 %v2649_v52  ;;  %v3415_v52 = vld [vmem:[#allocation16 + $0x8] sm:$0xff] }
 0x21b   :  { %2386 = vmatprep.subr.mxu0 %v3099_v3 }
 0x27d   :  { %v314_v55 = vpop.f32.mrf.mxu0 }
 0x27e   :  { %v315_v56 = vadd.f32 %v314_v55, %v247_v54 }
 0x27f   :  { %v2350_v57 = vpop.f32.mrf.mxu0 }
 0x280   :  { %v2060_v58 = vmul.f32 -1.442695, %v315_v56 }
 0x282   :  { %2727 = vpow2.f32 %v2060_v58 }
 0x28f   :  { %v2728_v59 = vpop.eup %2727 }
 0x290   :  { %v321_v60 = vadd.f32 1.0, %v2728_v59 }
 0x292   :  { %2729 = vrcp.f32 %v321_v60 }
 0x29d   :  { %v3289_v17 = vpop.f32.mrf.mxu0 }
 0x29f   :  { %v2730_v61 = vpop.eup %2729  ;;  %v3291_v19 = vpop.f32.mrf.mxu0 }
 0x2a0   :  { %v324_v62 = vmul.f32 %v2730_v61, %v315_v56  ;;  %v431_v61 = vlaneseq }
 0x2a1   :  { %v1010_v20 = vpop.f32.mrf.mxu0 }
 0x2a2   :  { %v332_v1 = vpack.c.bf16 %v324_v62, %v324_v62  ;;  %v3421_v62 = vshrl.u32 %v431_v61, 7 }
 0x2a3   :  { %v1011_v21 = vpop.f32.mrf.mxu0 }
 0x2a4   :  { %963 = vmatprep.mubr.bf16.mxu1 %v332_v1  ;;  %1045 = vmatprep.mubr.bf16.mxu0 %v332_v1  ;;  %v201_v1 = vld [vmem:[#allocation13 + $0x4] sm:$0xf] }
 0x2a5   :  { %964 = vmatmul.mubr.bf16.vlgmr.msra.gmra.mxu1 %v331_v63  ;;  %1046 = vmatmul.mubr.bf16.vlgmr.msra.gmra.mxu0 %v331_v63  ;;  %v3572_v63 = vsub.s32 1, %v3421_v62 }
 0x2a6   :  { %1055 = vmatpush1.bf16.msra.mxu1 %v2622_v4  ;;  %1086 = vmatprep.mubr.bf16.mxu1 %v3101_v48  ;;  %v441_v4 = vsub.s32 2, %v3421_v62 }
 0x2a7   :  { %1056 = vmatprep.subr.bf16.mxu1 %v2630_v5  ;;  %2418 = vmatprep.mubr.msk.f32.mxu0 %vm3100_vm0, %v3099_v3  ;;  %v445_v5 = vsub.s32 3, %v3421_v62 }
 0x2a8   :  { %2387 = vmatpush3.msra.mxu0 %v3360_v37 }
 0x2a9   :  { %2388 = vmatprep.subr.mxu0 %v3099_v3 }
 0x2aa   :  { %1057 = vmatpush1.bf16.msra.mxu1 %v2628_v6  ;;  %2389 = vmatpush3.msra.mxu0 %v3362_v38  ;;  %v438_v6 = vrot.slane %v201_v1, %v3572_v63 }
 0x2ab   :  { %1058 = vmatprep.subr.bf16.mxu1 %v2636_v7  ;;  %2390 = vmatprep.subr.mxu0 %v3099_v3  ;;  %v433_v7 = vsub.s32 0, %v3421_v62 }
 0x2ac   :  { %2391 = vmatpush3.msra.mxu0 %v3367_v39 }
 0x2ad   :  { %2392 = vmatprep.subr.mxu0 %v3099_v3 }
 0x2ae   :  { %1059 = vmatpush1.bf16.msra.mxu1 %v2634_v8  ;;  %2393 = vmatpush3.msra.mxu0 %v3371_v40  ;;  %v442_v8 = vrot.slane %v201_v1, %v441_v4 }
 0x2af   :  { %1060 = vmatprep.subr.bf16.mxu1 %v2642_v0  ;;  %2394 = vmatprep.subr.mxu0 %v3099_v3  ;;  %v446_v0 = vrot.slane %v201_v1, %v445_v5 }
 0x2b0   :  { %2395 = vmatpush3.msra.mxu0 %v3375_v41 }
 0x2b1   :  { %2396 = vmatprep.subr.mxu0 %v3099_v3 }
 0x2b2   :  { %1061 = vmatpush1.bf16.msra.mxu1 %v2640_v9  ;;  %2397 = vmatpush3.msra.mxu0 %v3379_v42 }
 0x2b3   :  { %1062 = vmatprep.subr.bf16.mxu1 %v2648_v10  ;;  %2398 = vmatprep.subr.mxu0 %v3099_v3  ;;  %v434_v10 = vrot.slane %v201_v1, %v433_v7 }
 0x2b4   :  { %2399 = vmatpush3.msra.mxu0 %v3383_v43 }
 0x2b5   :  { %2400 = vmatprep.subr.mxu0 %v3099_v3 }
 0x2b6   :  { %1063 = vmatpush1.bf16.msra.mxu1 %v2646_v11  ;;  %2401 = vmatpush3.msra.mxu0 %v3387_v44 }
 0x2b7   :  { %1064 = vmatprep.subr.bf16.mxu1 %v2654_v12  ;;  %2402 = vmatprep.subr.mxu0 %v3099_v3 }
 0x2b8   :  { %2403 = vmatpush3.msra.mxu0 %v3391_v45 }
 0x2b9   :  { %2404 = vmatprep.subr.mxu0 %v3099_v3 }
 0x2ba   :  { %1065 = vmatpush1.bf16.msra.mxu1 %v2652_v13  ;;  %2405 = vmatpush3.msra.mxu0 %v3395_v46 }
 0x2bb   :  { %1066 = vmatprep.subr.bf16.mxu1 %v2657_v14  ;;  %2406 = vmatprep.subr.mxu0 %v3099_v3 }
 0x2bc   :  { %2407 = vmatpush3.msra.mxu0 %v3399_v47 }
 0x2bd   :  { %2408 = vmatprep.subr.mxu0 %v3099_v3 }
 0x2be   :  { %1067 = vmatpush1.bf16.msra.mxu1 %v2655_v15  ;;  %2409 = vmatpush3.msra.mxu0 %v3403_v49  ;;  %v196_v15 = vld [vmem:[#allocation9] sm:$0xff] }
 0x2bf   :  { %1068 = vmatprep.subr.bf16.mxu1 %v2660_v16  ;;  %2410 = vmatprep.subr.mxu0 %v3099_v3 }
 0x2c0   :  { %2411 = vmatpush3.msra.mxu0 %v3407_v50 }
 0x2c1   :  { %2412 = vmatprep.subr.mxu0 %v3099_v3 }
 0x2c2   :  { %1069 = vmatpush1.bf16.msra.mxu1 %v2658_v18  ;;  %2413 = vmatpush3.msra.mxu0 %v3411_v51 }
 0x2c3   :  { %2351 = vmatprep.subr.mxu1 %v3099_v3  ;;  %2414 = vmatprep.subr.mxu0 %v3099_v3 }
 0x2c4   :  { %2415 = vmatpush3.msra.mxu0 %v3415_v52 }
 0x2c5   :  { %1087 = vmatmul.mubr.bf16.vlgmr.msra.gmra.mxu1 %v3280_v2  ;;  %v3309_v2 = vld [vmem:[#allocation14 + $0x60] sm:$0xff]  ;;  %2416 = vmatprep.subr.mxu0 %v3099_v3 }
 0x2c6   :  { %2383 = vmatprep.mubr.msk.f32.mxu1 %vm3100_vm0, %v3099_v3  ;;  %2352 = vmatpush3.msra.mxu1 %v3297_v22 }
 0x2c7   :  { %2353 = vmatprep.subr.mxu1 %v3099_v3 }
 0x2c8   :  { %2354 = vmatpush3.msra.mxu1 %v3301_v23 }
 0x2c9   :  { %2355 = vmatprep.subr.mxu1 %v3099_v3 }
 0x2ca   :  { %2356 = vmatpush3.msra.mxu1 %v3305_v24 }
 0x2cb   :  { %2357 = vmatprep.subr.mxu1 %v3099_v3 }
 0x2cc   :  { %2358 = vmatpush3.msra.mxu1 %v3309_v2 }
 0x2cd   :  { %2359 = vmatprep.subr.mxu1 %v3099_v3 }
 0x2ce   :  { %2360 = vmatpush3.msra.mxu1 %v3313_v25 }
 0x2cf   :  { %2361 = vmatprep.subr.mxu1 %v3099_v3 }
 0x2d0   :  { %2362 = vmatpush3.msra.mxu1 %v3317_v26 }
 0x2d1   :  { %2363 = vmatprep.subr.mxu1 %v3099_v3 }
 0x2d2   :  { %2364 = vmatpush3.msra.mxu1 %v3321_v27 }
 0x2d3   :  { %2365 = vmatprep.subr.mxu1 %v3099_v3 }
 0x2d4   :  { %2366 = vmatpush3.msra.mxu1 %v3325_v28 }
 0x2d5   :  { %2367 = vmatprep.subr.mxu1 %v3099_v3 }
 0x2d6   :  { %2368 = vmatpush3.msra.mxu1 %v3329_v29 }
 0x2d7   :  { %2369 = vmatprep.subr.mxu1 %v3099_v3 }
 0x2d8   :  { %2370 = vmatpush3.msra.mxu1 %v3331_v30 }
 0x2d9   :  { %2371 = vmatprep.subr.mxu1 %v3099_v3 }
 0x2da   :  { %2372 = vmatpush3.msra.mxu1 %v3335_v31 }
 0x2db   :  { %2373 = vmatprep.subr.mxu1 %v3099_v3 }
 0x2dc   :  { %2374 = vmatpush3.msra.mxu1 %v3339_v32 }
 0x2dd   :  { %2375 = vmatprep.subr.mxu1 %v3099_v3 }
 0x2de   :  { %2376 = vmatpush3.msra.mxu1 %v3343_v33 }
 0x2df   :  { %2377 = vmatprep.subr.mxu1 %v3099_v3 }
 0x2e0   :  { %2378 = vmatpush3.msra.mxu1 %v3347_v34 }
 0x2e1   :  { %2379 = vmatprep.subr.mxu1 %v3099_v3 }
 0x2e2   :  { %2380 = vmatpush3.msra.mxu1 %v3351_v35 }
 0x2e3   :  { %2381 = vmatprep.subr.mxu1 %v3099_v3 }
 0x2e4   :  { %2382 = vmatpush3.msra.mxu1 %v3355_v36 }
 0x2e5   :  { %2421 = vmatprep.subr.mxu1 %v3099_v3 }
 0x365   :  { %v965_v53 = vpop.f32.mrf.mxu1  ;;  %v1047_v54 = vpop.f32.mrf.mxu0 }
 0x366   :  { %v1048_v12 = vadd.f32 %v1047_v54, %v442_v8  ;;  %v966_v20 = vadd.f32 %v965_v53, %v434_v10  ;;  %v195_v53 = vld [vmem:[#allocation7] sm:$0xff]  ;;  %v194_v8 = vld [vmem:[#allocation3] sm:$0xff] }
 0x367   :  { %v967_v55 = vpop.f32.mrf.mxu1  ;;  %v1049_v56 = vpop.f32.mrf.mxu0 }
 0x368   :  { %v968_v9 = vadd.f32 %v967_v55, %v438_v6  ;;  %v1050_v13 = vadd.f32 %v1049_v56, %v446_v0  ;;  %v1007_v55 = vadd.f32 %v3289_v17, %v966_v20  ;;  %v2688_v20 = vld [vmem:[#allocation19 + $0x68] ss:$16 sps:$4 sm:$0xff]  }
 0x369   :  { %v969_v57 = vpop.f32.mrf.mxu1  ;;  %v1051_v58 = vpop.f32.mrf.mxu0 }
 0x36a   :  { %v1009_v14 = vadd.f32 %v3291_v19, %v968_v9 }
 0x36b   :  { %v970_v59 = vpop.f32.mrf.mxu1  ;;  %v1052_v60 = vpop.f32.mrf.mxu0 }
 0x36c   :  { %v2157_v59 = vmul.f32 -1.442695, %v1009_v14 }
 0x36e   :  { %2731 = vpow2.f32 %v2157_v59  ;;  %v2697_v59 = vld [vmem:[#allocation19 + $0x20] ss:$16 sps:$4 sm:$0xff]  }
 0x36f   :  { %2733 = vtanh.f32 %v1007_v55  ;;  %v2708_v55 = vld [vmem:[#allocation19 + $0xc] ss:$16 sps:$4 sm:$0xff]  }
 0x37b   :  { %v2732_v19 = vpop.eup %2731 }
 0x37c   :  { %v2734_v1 = vpop.eup %2733  ;;  %v1099_v9 = vadd.f32 1.0, %v2732_v19 }
 0x385   :  { %v1088_v11 = vpop.f32.mrf.mxu1 }
 0x386   :  { %v1089_v57 = vadd.f32 %v1088_v11, %v1048_v12 }
 0x387   :  { %v1090_v16 = vpop.f32.mrf.mxu1 }
 0x388   :  { %v1091_v18 = vadd.f32 %v1090_v16, %v1050_v13 }
 0x389   :  { %v1092_v21 = vpop.f32.mrf.mxu1 }
 0x38a   :  { %v1102_v58 = vadd.f32 %v1091_v18, %v196_v15  ;;  %v2696_v21 = vld [vmem:[#allocation19 + $0x4c] ss:$16 sps:$4 sm:$0xff]  }
 0x38b   :  { %v1093_v60 = vpop.f32.mrf.mxu1 }
 0x38c   :  { %v1103_v61 = vmax.f32 %v1102_v58, %v1089_v57  ;;  %v2700_v60 = vld [vmem:[#allocation19 + $0x28] ss:$16 sps:$4 sm:$0xff]  }
 0x38e   :  { %v1104_v6 = vsub.f32 %v1089_v57, %v1103_v61  ;;  %v1107_v63 = vsub.f32 %v1102_v58, %v1103_v61  ;;  %1981 = vst [vmem:[#allocation28] sm:$0xff] %v1103_v61  ;;  %v2694_v57 = vld [vmem:[#allocation19 + $0x48] ss:$16 sps:$4 sm:$0xff]   ;;  %v2699_v58 = vld [vmem:[#allocation19 + $0x24] ss:$16 sps:$4 sm:$0xff]  }
 0x38f   :  { %v2705_v61 = vld [vmem:[#allocation19 + $0x4] ss:$16 sps:$4 sm:$0xff]  }
 0x390   :  { %v1105_v54 = vmul.f32 1.442695, %v1104_v6  ;;  %v1108_v56 = vmul.f32 1.442695, %v1107_v63  ;;  %v2703_v6 = vld [vmem:[#allocation19] ss:$16 sps:$4 sm:$0xff]  }
 0x392   :  { %2735 = vpow2.f32 %v1105_v54  ;;  %v2706_v54 = vld [vmem:[#allocation19 + $0x8] ss:$16 sps:$4 sm:$0xff]  }
 0x393   :  { %2737 = vpow2.f32 %v1108_v56  ;;  %v2158_v56 = vld [vmem:[#allocation13 + $0x2] ss:$0 sm:$0xff] }
 0x394   :  { %2739 = vrcp.f32 %v1099_v9 }
 0x39f   :  { %v2736_v0 = vpop.eup %2735 }
 0x3a0   :  { %v2738_v10 = vpop.eup %2737  ;;  %v1111_v11 = vmul.f32 %v2736_v0, %v2734_v1 }
 0x3a1   :  { %v1113_v12 = vmul.f32 %v2738_v10, %v195_v53  ;;  %v1110_v13 = vmul.f32 %v2738_v10, %v194_v8  ;;  %v2740_v63 = vpop.eup %2739  ;;  %v2159_v53 = vld [vmem:[#allocation13 + $0x3] ss:$0 sm:$0xff] }
 0x3a3   :  { %v1114_v17 = vadd.f32 %v2736_v0, %v1113_v12  ;;  %v1112_v14 = vadd.f32 %v1111_v11, %v1110_v13  ;;  %v2709_v11 = vld [vmem:[#allocation20 + $0x78] sm:$0xff]   ;;  %v2711_v13 = vld [vmem:[#allocation20 + $0x70] sm:$0xff]  }
 0x3a4   :  { %v2710_v12 = vld [vmem:[#allocation20 + $0x38] sm:$0xff]  }
 0x3a5   :  { %1980 = vst [vmem:[#allocation26] sm:$0xff] %v1114_v17  ;;  %2741 = vrcp.f32 %v1114_v17  ;;  %1979 = vst [vmem:[#allocation25] sm:$0xff] %v1112_v14  ;;  %v1115_v15 = vmul.f32 %v2740_v63, %v1112_v14  ;;  %v2712_v17 = vld [vmem:[#allocation20 + $0x30] sm:$0xff]   ;;  %v2713_v14 = vld [vmem:[#allocation20 + $0x68] sm:$0xff]  }
 0x3a6   :  { %v2714_v63 = vld [vmem:[#allocation20 + $0x28] sm:$0xff]  }
 0x3b2   :  { %v2742_v16 = vpop.eup %2741 }
 0x3b3   :  { %v3437_v18 = vmul.f32 %v2742_v16, %v1115_v15  ;;  %v2715_v15 = vld [vmem:[#allocation20 + $0x60] sm:$0xff]  }
 0x3b4   :  { %v2716_v16 = vld [vmem:[#allocation20 + $0x20] sm:$0xff]  }
 0x3b5   :  { %2384 = vmatmul.mubr.f32.vlgmr.msra.gmra.mxu1 %v3437_v18  ;;  %1978 = vst [vmem:[#allocation23] sm:$0xff] %v3437_v18 }
 0x3b6   :  { %2422 = vmatpush3.msra.mxu1 %v3297_v22  ;;  %2453 = vmatprep.mubr.msk.f32.mxu1 %vm3100_vm0, %v3099_v3  ;;  %v1134_v22 = vld [vmem:[#allocation16] sm:$0xff] }
 0x3b7   :  { %2423 = vmatprep.subr.mxu1 %v3099_v3  ;;  %2417 = vmatpush3.msra.mxu0 %v1134_v22 }
 0x3b8   :  { %2424 = vmatpush3.msra.mxu1 %v3301_v23  ;;  %2456 = vmatprep.subr.mxu0 %v3099_v3 }
 0x3b9   :  { %2425 = vmatprep.subr.mxu1 %v3099_v3 }
 0x3ba   :  { %2426 = vmatpush3.msra.mxu1 %v3305_v24 }
 0x3bb   :  { %2427 = vmatprep.subr.mxu1 %v3099_v3 }
 0x3bc   :  { %2428 = vmatpush3.msra.mxu1 %v3309_v2 }
 0x3bd   :  { %2429 = vmatprep.subr.mxu1 %v3099_v3 }
 0x3be   :  { %2430 = vmatpush3.msra.mxu1 %v3313_v25 }
 0x3bf   :  { %2431 = vmatprep.subr.mxu1 %v3099_v3 }
 0x3c0   :  { %2432 = vmatpush3.msra.mxu1 %v3317_v26 }
 0x3c1   :  { %2433 = vmatprep.subr.mxu1 %v3099_v3 }
 0x3c2   :  { %2434 = vmatpush3.msra.mxu1 %v3321_v27 }
 0x3c3   :  { %2435 = vmatprep.subr.mxu1 %v3099_v3 }
 0x3c4   :  { %2436 = vmatpush3.msra.mxu1 %v3325_v28  ;;  %v2661_v28 = vld [vmem:[#allocation19 + $0xe0] ss:$16 sps:$4 sm:$0xff]  }
 0x3c5   :  { %2437 = vmatprep.subr.mxu1 %v3099_v3 }
 0x3c6   :  { %2438 = vmatpush3.msra.mxu1 %v3329_v29  ;;  %v2663_v29 = vld [vmem:[#allocation19 + $0xe4] ss:$16 sps:$4 sm:$0xff]  }
 0x3c7   :  { %2439 = vmatprep.subr.mxu1 %v3099_v3 }
 0x3c8   :  { %2440 = vmatpush3.msra.mxu1 %v3331_v30  ;;  %v2666_v30 = vld [vmem:[#allocation19 + $0xec] ss:$16 sps:$4 sm:$0xff]  }
 0x3c9   :  { %2441 = vmatprep.subr.mxu1 %v3099_v3 }
 0x3ca   :  { %2442 = vmatpush3.msra.mxu1 %v3335_v31  ;;  %v2669_v31 = vld [vmem:[#allocation19 + $0xc4] ss:$16 sps:$4 sm:$0xff]  }
 0x3cb   :  { %2443 = vmatprep.subr.mxu1 %v3099_v3 }
 0x3cc   :  { %2444 = vmatpush3.msra.mxu1 %v3339_v32  ;;  %v2675_v32 = vld [vmem:[#allocation19 + $0xa4] ss:$16 sps:$4 sm:$0xff]  }
 0x3cd   :  { %2445 = vmatprep.subr.mxu1 %v3099_v3 }
 0x3ce   :  { %2446 = vmatpush3.msra.mxu1 %v3343_v33  ;;  %v2673_v33 = vld [vmem:[#allocation19 + $0xa0] ss:$16 sps:$4 sm:$0xff]  }
 0x3cf   :  { %2447 = vmatprep.subr.mxu1 %v3099_v3 }
 0x3d0   :  { %2448 = vmatpush3.msra.mxu1 %v3347_v34  ;;  %v2681_v34 = vld [vmem:[#allocation19 + $0x84] ss:$16 sps:$4 sm:$0xff]  }
 0x3d1   :  { %2449 = vmatprep.subr.mxu1 %v3099_v3 }
 0x3d2   :  { %2450 = vmatpush3.msra.mxu1 %v3351_v35  ;;  %v2679_v35 = vld [vmem:[#allocation19 + $0x80] ss:$16 sps:$4 sm:$0xff]  }
 0x3d3   :  { %2451 = vmatprep.subr.mxu1 %v3099_v3 }
 0x3d4   :  { %2452 = vmatpush3.msra.mxu1 %v3355_v36  ;;  %v2687_v36 = vld [vmem:[#allocation19 + $0x64] ss:$16 sps:$4 sm:$0xff]  }
 0x3d5   :  { %1662 = vmatprep.subr.bf16.mxu1 %v2663_v29 }
 0x475   :  { %v1216_v23 = vpop.f32.mrf.mxu1 }
 0x476   :  { %2419 = vmatmul.mubr.f32.vlgmr.msra.gmra.mxu0 %v1216_v23  ;;  %v2719_v23 = vld [vmem:[#allocation20 + $0x50] sm:$0xff]  }
 0x477   :  { %v2385_v24 = vpop.f32.mrf.mxu1  ;;  %2457 = vmatpush3.msra.mxu0 %v3360_v37  ;;  %2488 = vmatprep.mubr.msk.f32.mxu0 %vm3100_vm0, %v3099_v3  ;;  %v2685_v37 = vld [vmem:[#allocation19 + $0x60] ss:$16 sps:$4 sm:$0xff]  }
 0x478   :  { %2458 = vmatprep.subr.mxu0 %v3099_v3  ;;  %v2720_v24 = vld [vmem:[#allocation20 + $0x10] sm:$0xff]  }
 0x479   :  { %2459 = vmatpush3.msra.mxu0 %v3362_v38  ;;  %v2693_v38 = vld [vmem:[#allocation19 + $0x44] ss:$16 sps:$4 sm:$0xff]  }
 0x47a   :  { %2460 = vmatprep.subr.mxu0 %v3099_v3 }
 0x47b   :  { %2461 = vmatpush3.msra.mxu0 %v3367_v39  ;;  %v2691_v39 = vld [vmem:[#allocation19 + $0x40] ss:$16 sps:$4 sm:$0xff]  }
 0x47c   :  { %2462 = vmatprep.subr.mxu0 %v3099_v3 }
 0x47d   :  { %2463 = vmatpush3.msra.mxu0 %v3371_v40 }
 0x47e   :  { %2464 = vmatprep.subr.mxu0 %v3099_v3 }
 0x47f   :  { %2465 = vmatpush3.msra.mxu0 %v3375_v41 }
 0x480   :  { %2466 = vmatprep.subr.mxu0 %v3099_v3 }
 0x481   :  { %2467 = vmatpush3.msra.mxu0 %v3379_v42 }
 0x482   :  { %2468 = vmatprep.subr.mxu0 %v3099_v3 }
 0x483   :  { %2469 = vmatpush3.msra.mxu0 %v3383_v43  ;;  %v2664_v43 = vld [vmem:[#allocation19 + $0xe8] ss:$16 sps:$4 sm:$0xff]  }
 0x484   :  { %2470 = vmatprep.subr.mxu0 %v3099_v3 }
 0x485   :  { %2471 = vmatpush3.msra.mxu0 %v3387_v44  ;;  %v2672_v44 = vld [vmem:[#allocation19 + $0xcc] ss:$16 sps:$4 sm:$0xff]  }
 0x486   :  { %2472 = vmatprep.subr.mxu0 %v3099_v3 }
 0x487   :  { %2473 = vmatpush3.msra.mxu0 %v3391_v45 }
 0x488   :  { %2474 = vmatprep.subr.mxu0 %v3099_v3 }
 0x489   :  { %2475 = vmatpush3.msra.mxu0 %v3395_v46  ;;  %v2670_v46 = vld [vmem:[#allocation19 + $0xc8] ss:$16 sps:$4 sm:$0xff]  }
 0x48a   :  { %2476 = vmatprep.subr.mxu0 %v3099_v3 }
 0x48b   :  { %2477 = vmatpush3.msra.mxu0 %v3399_v47  ;;  %v2678_v47 = vld [vmem:[#allocation19 + $0xac] ss:$16 sps:$4 sm:$0xff]  }
 0x48c   :  { %2478 = vmatprep.subr.mxu0 %v3099_v3 }
 0x48d   :  { %2479 = vmatpush3.msra.mxu0 %v3403_v49  ;;  %v2676_v49 = vld [vmem:[#allocation19 + $0xa8] ss:$16 sps:$4 sm:$0xff]  }
 0x48e   :  { %2480 = vmatprep.subr.mxu0 %v3099_v3 }
 0x48f   :  { %2481 = vmatpush3.msra.mxu0 %v3407_v50  ;;  %v2684_v50 = vld [vmem:[#allocation19 + $0x8c] ss:$16 sps:$4 sm:$0xff]  }
 0x490   :  { %2482 = vmatprep.subr.mxu0 %v3099_v3 }
 0x491   :  { %2483 = vmatpush3.msra.mxu0 %v3411_v51  ;;  %v2682_v51 = vld [vmem:[#allocation19 + $0x88] ss:$16 sps:$4 sm:$0xff]  }
 0x492   :  { %2484 = vmatprep.subr.mxu0 %v3099_v3 }
 0x493   :  { %2485 = vmatpush3.msra.mxu0 %v3415_v52  ;;  %v2690_v52 = vld [vmem:[#allocation19 + $0x6c] ss:$16 sps:$4 sm:$0xff]  }
 0x494   :  { %2486 = vmatprep.subr.mxu0 %v3099_v3  ;;  %v2667_v3 = vld [vmem:[#allocation19 + $0xc0] ss:$16 sps:$4 sm:$0xff]  }
 0x495   :  { %2487 = vmatpush3.msra.mxu0 %v1134_v22  ;;  %v2718_v22 = vld [vmem:[#allocation20 + $0x18] sm:$0xff]  }
 0x496   :  { %1703 = vmatprep.subr.bf16.mxu0 %v2666_v30 }
 0x536   :  { %v1286_v2 = vpop.f32.mrf.mxu0 }
 0x537   :  { %v3508_v25 = vsub.f32 %v3437_v18, %v1286_v2  ;;  %v2717_v18 = vld [vmem:[#allocation20 + $0x58] sm:$0xff]   ;;  %v2721_v2 = vld [vmem:[#allocation20 + $0x48] sm:$0xff]  }
 0x538   :  { %v2420_v26 = vpop.f32.mrf.mxu0 }
 0x539   :  { %v1291_v27 = vmul.f32 %v3508_v25, %v3508_v25  ;;  %v2723_v26 = vld [vmem:[#allocation20 + $0x40] sm:$0xff]  }
 0x53b   :  { %2454 = vmatmul.mubr.f32.vlgmr.msra.gmra.mxu1 %v1291_v27  ;;  %v2724_v27 = vld [vmem:[#allocation20] sm:$0xff]  }
 0x53c   :  { %1694 = vmatprep.mubr.bf16.mxu1 %v3101_v48  ;;  %1663 = vmatpush1.bf16.msra.mxu1 %v2661_v28  ;;  %v3515_v28 = vld [vmem:[#allocation13 + $0x8] sm:$0xf] }
 0x53d   :  { %1664 = vmatprep.subr.bf16.mxu1 %v2669_v31  ;;  %v1493_v29 = vrot.slane %v3515_v28, %v441_v4  ;;  %v1497_v30 = vrot.slane %v3515_v28, %v445_v5 }
 0x540   :  { %1665 = vmatpush1.bf16.msra.mxu1 %v2667_v3 }
 0x541   :  { %1666 = vmatprep.subr.bf16.mxu1 %v2675_v32 }
 0x544   :  { %1667 = vmatpush1.bf16.msra.mxu1 %v2673_v33 }
 0x545   :  { %1668 = vmatprep.subr.bf16.mxu1 %v2681_v34 }
 0x548   :  { %1669 = vmatpush1.bf16.msra.mxu1 %v2679_v35 }
 0x549   :  { %1670 = vmatprep.subr.bf16.mxu1 %v2687_v36 }
 0x54c   :  { %1671 = vmatpush1.bf16.msra.mxu1 %v2685_v37 }
 0x54d   :  { %1672 = vmatprep.subr.bf16.mxu1 %v2693_v38 }
 0x550   :  { %1673 = vmatpush1.bf16.msra.mxu1 %v2691_v39 }
 0x551   :  { %1674 = vmatprep.subr.bf16.mxu1 %v2699_v58 }
 0x554   :  { %1675 = vmatpush1.bf16.msra.mxu1 %v2697_v59 }
 0x555   :  { %1676 = vmatprep.subr.bf16.mxu1 %v2705_v61 }
 0x558   :  { %1677 = vmatpush1.bf16.msra.mxu1 %v2703_v6 }
 0x559   :  { %2294 = vmatprep.subr.bf16.mxu1 %v2709_v11 }
 0x5fb   :  { %v1358_v40 = vpop.f32.mrf.mxu1 }
 0x5fc   :  { %v1359_v41 = vadd.f32 1e-05, %v1358_v40 }
 0x5fd   :  { %v2455_v42 = vpop.f32.mrf.mxu1 }
 0x5fe   :  { %2743 = vrsqrt.f32 %v1359_v41 }
 0x60b   :  { %v2744_v45 = vpop.eup %2743 }
 0x60c   :  { %2489 = vmatmul.mubr.f32.vlgmr.msra.gmra.mxu0 %v2744_v45 }
 0x60d   :  { %1704 = vmatpush1.bf16.msra.mxu0 %v2664_v43  ;;  %1735 = vmatprep.mubr.bf16.mxu0 %v3101_v48  ;;  %v2702_v48 = vld [vmem:[#allocation19 + $0x2c] ss:$16 sps:$4 sm:$0xff]  }
 0x60e   :  { %1705 = vmatprep.subr.bf16.mxu0 %v2672_v44 }
 0x611   :  { %1706 = vmatpush1.bf16.msra.mxu0 %v2670_v46 }
 0x612   :  { %1707 = vmatprep.subr.bf16.mxu0 %v2678_v47 }
 0x615   :  { %1708 = vmatpush1.bf16.msra.mxu0 %v2676_v49 }
 0x616   :  { %1709 = vmatprep.subr.bf16.mxu0 %v2684_v50 }
 0x619   :  { %1710 = vmatpush1.bf16.msra.mxu0 %v2682_v51 }
 0x61a   :  { %1711 = vmatprep.subr.bf16.mxu0 %v2690_v52 }
 0x61d   :  { %1712 = vmatpush1.bf16.msra.mxu0 %v2688_v20 }
 0x61e   :  { %1713 = vmatprep.subr.bf16.mxu0 %v2696_v21 }
 0x621   :  { %1714 = vmatpush1.bf16.msra.mxu0 %v2694_v57 }
 0x622   :  { %1715 = vmatprep.subr.bf16.mxu0 %v2702_v48 }
 0x625   :  { %1716 = vmatpush1.bf16.msra.mxu0 %v2700_v60 }
 0x626   :  { %1717 = vmatprep.subr.bf16.mxu0 %v2708_v55 }
 0x629   :  { %1718 = vmatpush1.bf16.msra.mxu0 %v2706_v54 }
 0x6cc   :  { %v1429_v19 = vpop.f32.mrf.mxu0 }
 0x6cd   :  { %v1433_v1 = vmul.f32 %v1429_v19, %v3508_v25  ;;  %v2722_v25 = vld [vmem:[#allocation20 + $0x8] sm:$0xff]  }
 0x6ce   :  { %v2490_v8 = vpop.f32.mrf.mxu0 }
 0x6cf   :  { %v1440_v0 = vmul.f32 %v2158_v56, %v1433_v1 }
 0x6d1   :  { %v1447_v9 = vadd.f32 %v2159_v53, %v1440_v0 }
 0x6d3   :  { %v1448_v10 = vpack.c.bf16 %v1447_v9, %v1447_v9 }
 0x6d5   :  { %1695 = vmatmul.mubr.bf16.vlgmr.msra.gmra.mxu1 %v1448_v10  ;;  %1736 = vmatmul.mubr.bf16.vlgmr.msra.gmra.mxu0 %v1448_v10 }
 0x6d6   :  { %2295 = vmatpush3.bf16.msra.mxu1 %v2710_v12 }
 0x6d7   :  { %2296 = vmatprep.subr.bf16.mxu1 %v2711_v13 }
 0x6da   :  { %2297 = vmatpush3.bf16.msra.mxu1 %v2712_v17 }
 0x6db   :  { %2298 = vmatprep.subr.bf16.mxu1 %v2713_v14 }
 0x6de   :  { %2299 = vmatpush3.bf16.msra.mxu1 %v2714_v63  ;;  %v3102_v63 = vmov -1.0  }
 0x6df   :  { %2300 = vmatprep.subr.bf16.mxu1 %v2715_v15 }
 0x6e2   :  { %2301 = vmatpush3.bf16.msra.mxu1 %v2716_v16 }
 0x6e3   :  { %2302 = vmatprep.subr.bf16.mxu1 %v2717_v18 }
 0x6e6   :  { %2303 = vmatpush3.bf16.msra.mxu1 %v2718_v22 }
 0x6e7   :  { %2304 = vmatprep.subr.bf16.mxu1 %v2719_v23  ;;  %v1485_v23 = vrot.slane %v3515_v28, %v433_v7 }
 0x6ea   :  { %2305 = vmatpush3.bf16.msra.mxu1 %v2720_v24 }
 0x6eb   :  { %2306 = vmatprep.subr.bf16.mxu1 %v2721_v2 }
 0x6ee   :  { %2307 = vmatpush3.bf16.msra.mxu1 %v2722_v25 }
 0x6ef   :  { %2308 = vmatprep.subr.bf16.mxu1 %v2723_v26  ;;  %v3577_v26 = vsub.s32 1, %v3421_v62 }
 0x6f2   :  { %2309 = vmatpush3.bf16.msra.mxu1 %v2724_v27  ;;  %v1489_v27 = vrot.slane %v3515_v28, %v3577_v26 }
 0x795   :  { %v3523_v31 = vpop.f32.mrf.mxu1  ;;  %v1737_v3 = vpop.f32.mrf.mxu0 }
 0x796   :  { %v1738_v32 = vadd.f32 %v1737_v3, %v1493_v29 }
 0x797   :  { %v3525_v33 = vpop.f32.mrf.mxu1  ;;  %v1739_v34 = vpop.f32.mrf.mxu0 }
 0x798   :  { %v1746_v35 = vmul.f32 0.70710677, %v1738_v32  ;;  %v1740_v36 = vadd.f32 %v1739_v34, %v1497_v30  ;;  %v1744_v24 = vmul.f32 0.5, %v1738_v32 }
 0x799   :  { %v1700_v37 = vpop.f32.mrf.mxu1  ;;  %v1741_v38 = vpop.f32.mrf.mxu0 }
 0x79a   :  { %v1752_v39 = vand.u32 2147483647, %v1746_v35  ;;  %v1747_v40 = vmul.f32 0.70710677, %v1740_v36  ;;  %vm1748_vm1 = vcmp.ge.f32.partialorder %v1746_v35, 0.0  ;;  %v1745_v3 = vmul.f32 0.5, %v1740_v36 }
 0x79b   :  { %v1701_v41 = vpop.f32.mrf.mxu1  ;;  %v1742_v42 = vpop.f32.mrf.mxu0  ;;  %v1750_v15 = vsel %vm1748_vm1, 1.0, %v3102_v63  ;;  %v1697_v35 = vadd.f32 %v3523_v31, %v1485_v23  ;;  %v1699_v37 = vadd.f32 %v3525_v33, %v1489_v27 }
 0x79c   :  { %v1754_v4 = vmul.f32 0.3275911, %v1752_v39  ;;  %v1753_v43 = vand.u32 2147483647, %v1747_v40  ;;  %v1780_v46 = vsub.f32 0.0, %v1752_v39  ;;  %vm1749_vm2 = vcmp.ge.f32.partialorder %v1747_v40, 0.0 }
 0x79d   :  { %v1751_v25 = vsel %vm1749_vm2, 1.0, %v3102_v63 }
 0x79e   :  { %v1756_v44 = vadd.f32 1.0, %v1754_v4  ;;  %v1755_v45 = vmul.f32 0.3275911, %v1753_v43  ;;  %v1781_v47 = vsub.f32 0.0, %v1753_v43  ;;  %v1782_v49 = vmul.f32 %v1780_v46, %v1752_v39 }
 0x7a0   :  { %2745 = vrcp.f32 %v1756_v44  ;;  %v1757_v5 = vadd.f32 1.0, %v1755_v45  ;;  %v1783_v51 = vmul.f32 %v1781_v47, %v1753_v43  ;;  %v1784_v20 = vmul.f32 1.442695, %v1782_v49 }
 0x7a2   :  { %2747 = vrcp.f32 %v1757_v5  ;;  %v1786_v48 = vmul.f32 1.442695, %v1783_v51 }
 0x7a3   :  { %2749 = vpow2.f32 %v1784_v20 }
 0x7a4   :  { %2751 = vpow2.f32 %v1786_v48 }
 0x7ad   :  { %v2746_v50 = vpop.eup %2745 }
 0x7ae   :  { %v1762_v52 = vmul.f32 1.0614054, %v2746_v50 }
 0x7af   :  { %v2748_v21 = vpop.eup %2747 }
 0x7b0   :  { %v1764_v57 = vadd.f32 -1.4531521, %v1762_v52  ;;  %v1763_v58 = vmul.f32 1.0614054, %v2748_v21  ;;  %v2750_v10 = vpop.eup %2749 }
 0x7b1   :  { %v2752_v17 = vpop.eup %2751 }
 0x7b2   :  { %v1766_v59 = vmul.f32 %v2746_v50, %v1764_v57  ;;  %v1765_v60 = vadd.f32 -1.4531521, %v1763_v58 }
 0x7b4   :  { %v1768_v61 = vadd.f32 1.4214138, %v1766_v59  ;;  %v1767_v55 = vmul.f32 %v2748_v21, %v1765_v60 }
 0x7b6   :  { %v1770_v6 = vmul.f32 %v2746_v50, %v1768_v61  ;;  %v1769_v54 = vadd.f32 1.4214138, %v1767_v55 }
 0x7b8   :  { %v1772_v56 = vadd.f32 -0.28449672, %v1770_v6  ;;  %v1771_v19 = vmul.f32 %v2748_v21, %v1769_v54 }
 0x7ba   :  { %v1774_v1 = vmul.f32 %v2746_v50, %v1772_v56  ;;  %v1773_v53 = vadd.f32 -0.28449672, %v1771_v19 }
 0x7bc   :  { %v1776_v8 = vadd.f32 0.2548296, %v1774_v1  ;;  %v1775_v0 = vmul.f32 %v2748_v21, %v1773_v53 }
 0x7be   :  { %v1778_v9 = vmul.f32 %v2746_v50, %v1776_v8  ;;  %v1777_v11 = vadd.f32 0.2548296, %v1775_v0 }
 0x7c0   :  { %v1788_v12 = vmul.f32 %v2750_v10, %v1778_v9  ;;  %v1779_v13 = vmul.f32 %v2748_v21, %v1777_v11 }
 0x7c2   :  { %v1790_v14 = vsub.f32 1.0, %v1788_v12  ;;  %v1789_v16 = vmul.f32 %v2752_v17, %v1779_v13 }
 0x7c4   :  { %v1792_v18 = vmul.f32 %v1790_v14, %v1750_v15  ;;  %v1791_v22 = vsub.f32 1.0, %v1789_v16 }
 0x7c6   :  { %v1794_v2 = vadd.f32 1.0, %v1792_v18  ;;  %v1793_v29 = vmul.f32 %v1791_v22, %v1751_v25 }
 0x7c8   :  { %v1796_v30 = vmul.f32 %v1794_v2, %v1744_v24  ;;  %v1795_v34 = vadd.f32 1.0, %v1793_v29 }
 0x7ca   :  { %v1797_v38 = vmul.f32 %v1795_v34, %v1745_v3  ;;  %v1798_v39 = vmul.f32 %v1796_v30, %v1697_v35 }
 0x7cc   :  { %v1799_v40 = vmul.f32 %v1797_v38, %v1699_v37  ;;  %v1800_v7 = vpack.c.bf16 %v1798_v39, %v1798_v39 }
 0x7ce   :  { %v1801_v41 = vpack.c.bf16 %v1799_v40, %v1799_v40 }
 0x7d0   :  { %1968 = vmatprep.mubr.bf16.mxu1 %v1801_v41 }
 0x7d1   :  { %1969 = vmatmul.mubr.bf16.vlgmr.msra.gmra.mxu1 %v1800_v7 }
 0x7d2   :  { %2973 = shalt.err (!%p2970_p12)
}
 0x7d3   :  { %2001 = dma.vmem_to_hbm [thread:$0]  %s1999_s20, 128, %s3567_s14, [#allocation24]  }
 0x7d4   :  { %s2982_s23 = scalar_lea.vmem %s2019_s4, 128  ;;  %p2987_p0 = scmp.lt.s32.totalorder %s2019_s4, %s2019_s4 }
 0x7d5   :  { %p2983_p13 = scmp.ne.s32.totalorder %s2019_s4, %s2982_s23  ;;  %p2988_p1 = scmp.lt.s32.totalorder %s2982_s23, %s2982_s23 }
 0x7d7   :  { %p2989_p2 = por %p2988_p1, %p2987_p0 }
 0x7d9   :  { %p2990_p3 = pnand %p2989_p2, %p2983_p13 }
 0x7db   :  { %2993 = shalt.err (!%p2990_p3)
}
 0x7dc   :  { %2021 = dma.vmem_to_hbm [thread:$0]  %s2019_s4, 128, %s3569_s16, [#allocation27]  }
 0x7dd   :  { %s3105_s7 = smov [#allocation25]  }
 0x7de   :  { %s2008_s3 = sshll.u32 %s3105_s7, 4  ;;  %s2009_s3 = int_to_ptr.vmem [resolvable:$true] %s2008_s3 }
 0x7df   :  { %s3002_s25 = scalar_lea.vmem %s2009_s3, 128  ;;  %p3007_p5 = scmp.lt.s32.totalorder %s2009_s3, %s2009_s3 }
 0x7e0   :  { %p3003_p4 = scmp.ne.s32.totalorder %s2009_s3, %s3002_s25  ;;  %p3008_p6 = scmp.lt.s32.totalorder %s3002_s25, %s3002_s25 }
 0x7e2   :  { %p3009_p7 = por %p3008_p6, %p3007_p5 }
 0x7e4   :  { %p3010_p8 = pnand %p3009_p7, %p3003_p4 }
 0x7e6   :  { %3013 = shalt.err (!%p3010_p8)
}
 0x7e7   :  { %2011 = dma.vmem_to_hbm [thread:$0]  %s2009_s3, 128, %s3568_s15, [#allocation24]  }
 0x7e8   :  { %s3106_s9 = smov [#allocation28]  }
 0x7e9   :  { %s2028_s18 = sshll.u32 %s3106_s9, 4  ;;  %s2029_s18 = int_to_ptr.vmem [resolvable:$true] %s2028_s18 }
 0x7ea   :  { %s3022_s19 = scalar_lea.vmem %s2029_s18, 128  ;;  %p3027_p10 = scmp.lt.s32.totalorder %s2029_s18, %s2029_s18 }
 0x7eb   :  { %p3023_p9 = scmp.ne.s32.totalorder %s2029_s18, %s3022_s19  ;;  %p3028_p11 = scmp.lt.s32.totalorder %s3022_s19, %s3022_s19 }
 0x7ed   :  { %p3029_p12 = por %p3028_p11, %p3027_p10 }
 0x7ef   :  { %p3030_p13 = pnand %p3029_p12, %p3023_p9 }
 0x7f1   :  { %3033 = shalt.err (!%p3030_p13)
}
 0x7f2   :  { %2031 = dma.vmem_to_hbm [thread:$0]  %s2029_s18, 128, %s3570_s17, [#allocation27]   ;;  %v2192_v28 = vld [vmem:[#allocation13 + $0xc] ss:$0 sm:$0xff] }
 0x7f3   :  { %s3107_s15 = smov [#allocation22]   ;;  %v2753_v4 = vld [vmem:[%s3575_s28] sm:$0xff] }
 0x7f4   :  { %s1988_s29 = sshll.u32 %s3107_s15, 4  ;;  %s1989_s29 = int_to_ptr.vmem [resolvable:$true] %s1988_s29 }
 0x7f5   :  { %s3042_s12 = scalar_lea.vmem %s1989_s29, 128  ;;  %p3047_p1 = scmp.lt.s32.totalorder %s1989_s29, %s1989_s29 }
 0x7f6   :  { %p3043_p0 = scmp.ne.s32.totalorder %s1989_s29, %s3042_s12  ;;  %p3048_p2 = scmp.lt.s32.totalorder %s3042_s12, %s3042_s12 }
 0x7f8   :  { %p3049_p3 = por %p3048_p2, %p3047_p1 }
 0x7fa   :  { %p3050_p4 = pnand %p3049_p3, %p3043_p0 }
 0x891   :  { %v2310_v62 = vpop.f32.mrf.mxu1 }
 0x893   :  { %v2311_v31 = vpop.f32.mrf.mxu1 }
 0x894   :  { %v2312_v32 = vadd.f32 %v2311_v31, %v2310_v62 }
 0x895   :  { %v2313_v33 = vpop.f32.mrf.mxu1 }
 0x896   :  { %v1971_v36 = vadd.f32 %v2312_v32, %v2192_v28 }
 0x897   :  { %v2314_v42 = vpop.f32.mrf.mxu1 }
 0x898   :  { %v1976_v43 = vadd.f32 %v2753_v4, %v1971_v36 }
 0x89a   :  { %1977 = vst [vmem:[#allocation22] sm:$0xff] %v1976_v43 }
 0x89b   :  { %3053 = shalt.err (!%p3050_p4)
}
 0x89c   :  { %1991 = dma.vmem_to_hbm [thread:$0]  %s1989_s29, 128, %s3566_s13, [#allocation5]  }
 0x89d   :  { %3076 = dma.done.wait [#allocation5], 128  }
 0x89e   :  { %3077 = vsyncadd [#allocation5], 4294967168 }
 0x89f   :  { %3078 = dma.done.wait [#allocation24], 256  }
 0x8a0   :  { %3079 = vsyncadd [#allocation24], 4294967040 }
 0x8a1   :  { %3080 = dma.done.wait [#allocation27], 256  }
 0x8a2   :  { %3081 = vsyncadd [#allocation27], 4294967040 }
 0x8a3   :  { %2047 = vsyncpa [#allocation4], 1 }
 0x8a4   :  { %2048 = vsyncpa [#allocation8], 1 }
 0x8a5   :  { %2049 = vsyncpa [#allocation12], 1 }
 0x8a6   :  { %2050 = vsyncpa [#allocation15], 1 }
 0x8a7   :  { %2051 = vsyncpa [#allocation18], 1 }
 0x8a8   :  { %2052 = vsyncpa [#allocation21], 1 }
 0x8a9   :  { %2053 = vsyncpa [#allocation5], 1 }
 0x8aa   :  { %2054 = vsyncpa [#allocation24], 1 }
 0x8ab   :  { %2055 = vsyncpa [#allocation27], 1 }
 0x8ac   :  { %2056 = vsyncpa [#allocation6], 1 }

</bundles_post_ra>
